<compile_context>
chip_gen: v7x
topology: tpu7x:2x2x1
jax: 0.10.0
libtpu: 0.0.40
codegen_flags: <defaults>
</compile_context>

<pallas_src>
import jax
import jax.numpy as jnp
from jax.experimental import pallas as pl
from jax.experimental.pallas import tpu as pltpu


# ---------------------------------------------------------------------------
# Pallas kernel: full forward pass for one batch tile
# ---------------------------------------------------------------------------
def fingerprint_kernel(x_ref,
                       c1w_ref, c1s_ref, c1t_ref,
                       c2w_ref, c2s_ref, c2t_ref,
                       c3w_ref, c3s_ref, c3t_ref,
                       f1w_ref, f1s_ref, f1t_ref,
                       f2w_ref, f2s_ref, f2t_ref,
                       f3w_ref, f3b_ref,
                       out_ref):
    x = x_ref[...]                                   # (TB, L) float32
    TB, L = x.shape
    h = x.reshape(TB, L, 1)                          # (TB, L, Cin=1), channels on lanes

    def conv_bn_relu_pool(h, w, s, t, K, pad):
        # h: (TB, L, Cin) f32; w: (K*Cin, Cout) bf16, rows ordered (k, cin);
        # s, t: (1, Cout) f32 (folded BN scale/shift including conv bias).
        B_, L_, Cin = h.shape
        Cout = w.shape[1]
        hb = h.astype(jnp.bfloat16)
        zpad = jnp.zeros((B_, pad, Cin), dtype=jnp.bfloat16)
        hp = jnp.concatenate([zpad, hb, zpad], axis=1)            # (B, L + 2*pad, Cin)
        # im2col: stack the K shifted views along the channel (lane) axis, then one matmul.
        cols = [hp[:, k:k + L_, :] for k in range(K)]
        patches = jnp.concatenate(cols, axis=-1).reshape(B_ * L_, K * Cin)
        acc = jnp.dot(patches, w, preferred_element_type=jnp.float32)   # (B*L, Cout) f32
        y = jnp.maximum(acc * s + t, 0.0)                         # folded BN + ReLU (f32)
        y3 = y.reshape(B_ * L_ // 2, 2, Cout)                     # MaxPool1d(kernel=2, stride=2)
        y = jnp.maximum(y3[:, 0, :], y3[:, 1, :])
        return y.reshape(B_, L_ // 2, Cout)

    h = conv_bn_relu_pool(h, c1w_ref[...], c1s_ref[...], c1t_ref[...], K=5, pad=2)
    h = conv_bn_relu_pool(h, c2w_ref[...], c2s_ref[...], c2t_ref[...], K=3, pad=1)
    h = conv_bn_relu_pool(h, c3w_ref[...], c3s_ref[...], c3t_ref[...], K=3, pad=1)
    # h: (TB, L3, 128)

    # fc1 (+ folded bn4): accumulate over the length positions instead of a lane-merging
    # flatten; f1w is stored (L3, 128, H2) to match PyTorch's channel-major flatten.
    L3 = h.shape[1]
    H2 = f1w_ref.shape[2]
    hb = h.astype(jnp.bfloat16)
    acc1 = jnp.zeros((TB, H2), jnp.float32)
    for l in range(L3):                                           # static unroll
        acc1 = acc1 + jnp.dot(hb[:, l, :], f1w_ref[l],
                              preferred_element_type=jnp.float32)
    h1 = jnp.maximum(acc1 * f1s_ref[...] + f1t_ref[...], 0.0)
    # dropout1: identity in eval mode

    # fc2 (+ folded bn5)
    h2 = jnp.maximum(
        jnp.dot(h1.astype(jnp.bfloat16), f2w_ref[...],
                preferred_element_type=jnp.float32) * f2s_ref[...] + f2t_ref[...],
        0.0)
    # dropout2: identity in eval mode

    # fc3 (columns zero-padded to 128 lanes for dense stores)
    out_ref[...] = (jnp.dot(h2.astype(jnp.bfloat16), f3w_ref[...],
                            preferred_element_type=jnp.float32) + f3b_ref[...])


# ---------------------------------------------------------------------------
# Wrapper: batch-tiled grid, weights VMEM-resident via constant index_maps
# ---------------------------------------------------------------------------
def _round_up(n, m):
    return (n + m - 1) // m * m


def forward(x, flat_params, num_classes, *, batch_tile=None):
    B, L = x.shape
    assert L % 8 == 0, "input_size must be divisible by 8 (three stride-2 max-pools)"

    if batch_tile is None:
        batch_tile = min(128, _round_up(B, 8))
    tb = _round_up(batch_tile, 8)
    B_pad = _round_up(B, tb)
    xp = jnp.pad(x, ((0, B_pad - B), (0, 0))) if B_pad != B else x

    nc_pad = flat_params[-1].shape[-1]                 # 128 (padded classifier width)
    operands = [xp] + list(flat_params)

    def const_map(nd):
        return lambda i: (0,) * nd

    in_specs = [pl.BlockSpec((tb, L), lambda i: (i, 0))]
    in_specs += [pl.BlockSpec(p.shape, const_map(p.ndim)) for p in flat_params]
    out_specs = pl.BlockSpec((tb, nc_pad), lambda i: (i, 0))

    # advisory cost estimate
    L3 = L // 8
    H2 = flat_params[10].shape[1]
    H = flat_params[13].shape[1]
    flops = 2 * B_pad * (L * 5 * 1 * 32
                         + (L // 2) * 3 * 32 * 64
                         + (L // 4) * 3 * 64 * 128
                         + L3 * 128 * H2 + H2 * H + H * nc_pad)
    bytes_accessed = (int(xp.size) * xp.dtype.itemsize
                      + B_pad * nc_pad * 4
                      + sum(int(p.size) * p.dtype.itemsize for p in flat_params))

    out = pl.pallas_call(
        fingerprint_kernel,
        out_shape=jax.ShapeDtypeStruct((B_pad, nc_pad), jnp.float32),
        grid_spec=pltpu.PrefetchScalarGridSpec(
            num_scalar_prefetch=0,
            grid=(B_pad // tb,),
            in_specs=in_specs,
            out_specs=out_specs,
        ),
        compiler_params=pltpu.CompilerParams(
            dimension_semantics=("parallel",),
            vmem_limit_bytes=48 * 1024 * 1024,
        ),
        cost_estimate=pl.CostEstimate(flops=flops, transcendentals=0,
                                      bytes_accessed=bytes_accessed),
    )(*operands)
    return out[:B, :num_classes]


# ---------------------------------------------------------------------------
# Deterministic synthetic parameters (shapes from the module __init__),
# eval-mode BatchNorm folded into per-channel scale/shift; matmul weights bf16.
# ---------------------------------------------------------------------------
def make_params(key, input_size, hidden_size, num_classes):
    eps = 1e-5
    keys = jax.random.split(key, 32)
    kit = iter(keys)

    def normal(shape, scale=0.1):
        return jax.random.normal(next(kit), shape, dtype=jnp.float32) * scale

    def bn_fold(cout, bias):
        gamma = 1.0 + normal((cout,))
        beta = normal((cout,))
        mean = normal((cout,))
        var = 1.0 + jnp.abs(normal((cout,)))
        s = gamma / jnp.sqrt(var + eps)
        t = beta + s * (bias - mean)
        return s.reshape(1, cout), t.reshape(1, cout)

    flat = []
    # conv layers: (Cin, Cout, K, pad)
    for (cin, cout, K, pad) in [(1, 32, 5, 2), (32, 64, 3, 1), (64, 128, 3, 1)]:
        w = normal((cout, cin, K), scale=(cin * K) ** -0.5)     # PyTorch weight layout
        b = normal((cout,))
        s, t = bn_fold(cout, b)
        # reorder to (K*Cin, Cout), rows ordered (k, cin) -> matches kernel's im2col
        w2d = jnp.transpose(w, (2, 1, 0)).reshape(K * cin, cout).astype(jnp.bfloat16)
        flat += [w2d, s, t]

    L3 = input_size // 8
    fc_in = L3 * 128
    H2 = hidden_size * 2
    H = hidden_size
    NC_PAD = 128

    # fc1 (+ bn4): PyTorch flatten of the NCL tensor is channel-major (index = c*L3 + l);
    # lay the weight out as (L3, 128, H2) for the kernel's per-l accumulation.
    w1 = normal((H2, fc_in), scale=fc_in ** -0.5)
    b1 = normal((H2,))
    s1, t1 = bn_fold(H2, b1)
    fw1 = jnp.transpose(w1.reshape(H2, 128, L3), (2, 1, 0)).astype(jnp.bfloat16)

    # fc2 (+ bn5)
    w2 = normal((H, H2), scale=H2 ** -0.5)
    b2 = normal((H,))
    s2, t2 = bn_fold(H, b2)
    fw2 = w2.T.astype(jnp.bfloat16)

    # fc3: pad output columns to 128 lanes (zeros) for dense stores
    w3 = normal((num_classes, H), scale=H ** -0.5)
    b3 = normal((num_classes,))
    fw3 = jnp.zeros((H, NC_PAD), jnp.float32).at[:, :num_classes].set(w3.T).astype(jnp.bfloat16)
    fb3 = jnp.zeros((1, NC_PAD), jnp.float32).at[:, :num_classes].set(b3.reshape(1, -1))

    flat += [fw1, s1, t1, fw2, s2, t2, fw3, fb3]
    return flat


# ---------------------------------------------------------------------------
# Pure-JAX reference (same folded/bf16 params) for correctness check
# ---------------------------------------------------------------------------
def reference_forward(x, flat, num_classes):
    (c1w, c1s, c1t, c2w, c2s, c2t, c3w, c3s, c3t,
     f1w, f1s, f1t, f2w, f2s, f2t, f3w, f3b) = flat

    def conv_block(h, w, s, t, K, pad):
        B_, L_, Cin = h.shape
        Cout = w.shape[1]
        hb = h.astype(jnp.bfloat16)
        z = jnp.zeros((B_, pad, Cin), jnp.bfloat16)
        hp = jnp.concatenate([z, hb, z], axis=1)
        acc = jnp.zeros((B_, L_, Cout), jnp.float32)
        for k in range(K):
            acc = acc + jnp.einsum('blc,co->blo', hp[:, k:k + L_, :],
                                   w[k * Cin:(k + 1) * Cin, :],
                                   preferred_element_type=jnp.float32)
        y = jnp.maximum(acc * s.reshape(1, 1, Cout) + t.reshape(1, 1, Cout), 0.0)
        return jnp.max(y.reshape(B_, L_ // 2, 2, Cout), axis=2)

    h = x[:, :, None]
    h = conv_block(h, c1w, c1s, c1t, 5, 2)
    h = conv_block(h, c2w, c2s, c2t, 3, 1)
    h = conv_block(h, c3w, c3s, c3t, 3, 1)

    # PyTorch-equivalent channel-major flatten + fc1/bn4
    B_, L3, C = h.shape
    z = jnp.transpose(h, (0, 2, 1)).reshape(B_, C * L3).astype(jnp.bfloat16)
    w1cm = jnp.transpose(f1w, (1, 0, 2)).reshape(C * L3, -1)   # rows ordered (c, l)
    h1 = jnp.maximum(jnp.dot(z, w1cm, preferred_element_type=jnp.float32) * f1s + f1t, 0.0)
    h2 = jnp.maximum(jnp.dot(h1.astype(jnp.bfloat16), f2w,
                             preferred_element_type=jnp.float32) * f2s + f2t, 0.0)
    out = jnp.dot(h2.astype(jnp.bfloat16), f3w,
                  preferred_element_type=jnp.float32) + f3b
    return out[:, :num_classes]


if __name__ == "__main__":
    batch, input_size, hidden_size, num_classes = 2, 16, 32, 10

    key = jax.random.PRNGKey(0)
    kx, kp = jax.random.split(key)
    x = jax.random.normal(kx, (batch, input_size), dtype=jnp.float32)
    flat_params = make_params(kp, input_size, hidden_size, num_classes)

    out = forward(x, flat_params, num_classes)
    out = jax.block_until_ready(out)

    ref = reference_forward(x, flat_params, num_classes)
    assert out.shape == (batch, num_classes)
    assert bool(jnp.all(jnp.isfinite(out)))
    assert jnp.allclose(out, ref, rtol=1e-2, atol=5e-3), "kernel/reference mismatch"

    print("KERNEL_OK")
</pallas_src>

<mosaic_0001>
module attributes {stable_mosaic.version = 11 : i64} {
  func.func @fingerprint_kernel(%arg0: i32, %arg1: memref<8x16xf32, #tpu.memory_space<vmem>>, %arg2: memref<5x32xbf16, #tpu.memory_space<vmem>>, %arg3: memref<1x32xf32, #tpu.memory_space<vmem>>, %arg4: memref<1x32xf32, #tpu.memory_space<vmem>>, %arg5: memref<96x64xbf16, #tpu.memory_space<vmem>>, %arg6: memref<1x64xf32, #tpu.memory_space<vmem>>, %arg7: memref<1x64xf32, #tpu.memory_space<vmem>>, %arg8: memref<192x128xbf16, #tpu.memory_space<vmem>>, %arg9: memref<1x128xf32, #tpu.memory_space<vmem>>, %arg10: memref<1x128xf32, #tpu.memory_space<vmem>>, %arg11: memref<2x128x64xbf16, #tpu.memory_space<vmem>>, %arg12: memref<1x64xf32, #tpu.memory_space<vmem>>, %arg13: memref<1x64xf32, #tpu.memory_space<vmem>>, %arg14: memref<64x32xbf16, #tpu.memory_space<vmem>>, %arg15: memref<1x32xf32, #tpu.memory_space<vmem>>, %arg16: memref<1x32xf32, #tpu.memory_space<vmem>>, %arg17: memref<32x128xbf16, #tpu.memory_space<vmem>>, %arg18: memref<1x128xf32, #tpu.memory_space<vmem>>, %arg19: memref<8x128xf32, #tpu.memory_space<vmem>>) attributes {dimension_semantics = [#tpu.dimension_semantics<parallel>], iteration_bounds = array<i64: 1>, scalar_prefetch = 0 : i64, scratch_operands = 0 : i64, tpu.core_type = #tpu.core_type<tc>, window_params = [{transform_indices = @transform_0, window_bounds = array<i64: 8, 16>}, {pipeline_mode = #tpu.pipeline_mode<synchronous>, transform_indices = @transform_1, window_bounds = array<i64: 5, 32>}, {pipeline_mode = #tpu.pipeline_mode<synchronous>, transform_indices = @transform_2, window_bounds = array<i64: 1, 32>}, {pipeline_mode = #tpu.pipeline_mode<synchronous>, transform_indices = @transform_3, window_bounds = array<i64: 1, 32>}, {pipeline_mode = #tpu.pipeline_mode<synchronous>, transform_indices = @transform_4, window_bounds = array<i64: 96, 64>}, {pipeline_mode = #tpu.pipeline_mode<synchronous>, transform_indices = @transform_5, window_bounds = array<i64: 1, 64>}, {pipeline_mode = #tpu.pipeline_mode<synchronous>, transform_indices = @transform_6, window_bounds = array<i64: 1, 64>}, {pipeline_mode = #tpu.pipeline_mode<synchronous>, transform_indices = @transform_7, window_bounds = array<i64: 192, 128>}, {pipeline_mode = #tpu.pipeline_mode<synchronous>, transform_indices = @transform_8, window_bounds = array<i64: 1, 128>}, {pipeline_mode = #tpu.pipeline_mode<synchronous>, transform_indices = @transform_9, window_bounds = array<i64: 1, 128>}, {pipeline_mode = #tpu.pipeline_mode<synchronous>, transform_indices = @transform_10, window_bounds = array<i64: 2, 128, 64>}, {pipeline_mode = #tpu.pipeline_mode<synchronous>, transform_indices = @transform_11, window_bounds = array<i64: 1, 64>}, {pipeline_mode = #tpu.pipeline_mode<synchronous>, transform_indices = @transform_12, window_bounds = array<i64: 1, 64>}, {pipeline_mode = #tpu.pipeline_mode<synchronous>, transform_indices = @transform_13, window_bounds = array<i64: 64, 32>}, {pipeline_mode = #tpu.pipeline_mode<synchronous>, transform_indices = @transform_14, window_bounds = array<i64: 1, 32>}, {pipeline_mode = #tpu.pipeline_mode<synchronous>, transform_indices = @transform_15, window_bounds = array<i64: 1, 32>}, {pipeline_mode = #tpu.pipeline_mode<synchronous>, transform_indices = @transform_16, window_bounds = array<i64: 32, 128>}, {pipeline_mode = #tpu.pipeline_mode<synchronous>, transform_indices = @transform_17, window_bounds = array<i64: 1, 128>}, {transform_indices = @transform_18, window_bounds = array<i64: 8, 128>}]} {
    %c0 = arith.constant 0 : index
    %c0_0 = arith.constant 0 : index
    %0 = vector.load %arg1[%c0, %c0_0] : memref<8x16xf32, #tpu.memory_space<vmem>>, vector<8x16xf32>
    %1 = vector.shape_cast %0 : vector<8x16xf32> to vector<8x16x1xf32>
    %c0_1 = arith.constant 0 : index
    %c0_2 = arith.constant 0 : index
    %2 = vector.load %arg2[%c0_1, %c0_2] : memref<5x32xbf16, #tpu.memory_space<vmem>>, vector<5x32xbf16>
    %c0_3 = arith.constant 0 : index
    %c0_4 = arith.constant 0 : index
    %3 = vector.load %arg3[%c0_3, %c0_4] : memref<1x32xf32, #tpu.memory_space<vmem>>, vector<1x32xf32>
    %c0_5 = arith.constant 0 : index
    %c0_6 = arith.constant 0 : index
    %4 = vector.load %arg4[%c0_5, %c0_6] : memref<1x32xf32, #tpu.memory_space<vmem>>, vector<1x32xf32>
    %5 = arith.truncf %1 : vector<8x16x1xf32> to vector<8x16x1xbf16>
    %cst = arith.constant 0.000000e+00 : bf16
    %6 = vector.broadcast %cst : bf16 to vector<8x2x1xbf16>
    %7 = tpu.concatenate %6, %5, %6 in 1 : vector<8x2x1xbf16>, vector<8x16x1xbf16>, vector<8x2x1xbf16> -> vector<8x20x1xbf16>
    %8 = vector.extract_strided_slice %7 {offsets = [0, 0, 0], sizes = [8, 16, 1], strides = [1, 1, 1]} : vector<8x20x1xbf16> to vector<8x16x1xbf16>
    %9 = vector.extract_strided_slice %7 {offsets = [0, 1, 0], sizes = [8, 16, 1], strides = [1, 1, 1]} : vector<8x20x1xbf16> to vector<8x16x1xbf16>
    %10 = vector.extract_strided_slice %7 {offsets = [0, 2, 0], sizes = [8, 16, 1], strides = [1, 1, 1]} : vector<8x20x1xbf16> to vector<8x16x1xbf16>
    %11 = vector.extract_strided_slice %7 {offsets = [0, 3, 0], sizes = [8, 16, 1], strides = [1, 1, 1]} : vector<8x20x1xbf16> to vector<8x16x1xbf16>
    %12 = vector.extract_strided_slice %7 {offsets = [0, 4, 0], sizes = [8, 16, 1], strides = [1, 1, 1]} : vector<8x20x1xbf16> to vector<8x16x1xbf16>
    %13 = tpu.concatenate %8, %9, %10, %11, %12 in 2 : vector<8x16x1xbf16>, vector<8x16x1xbf16>, vector<8x16x1xbf16>, vector<8x16x1xbf16>, vector<8x16x1xbf16> -> vector<8x16x5xbf16>
    %14 = vector.shape_cast %13 : vector<8x16x5xbf16> to vector<128x5xbf16>
    %cst_7 = arith.constant dense<0.000000e+00> : vector<128x32xf32>
    %15 = tpu.matmul %14, %2, %cst_7 {dimension_numbers = #tpu.dot_dimension_numbers<[1], [0], [0], [1], [0, 0, 1, 1], [], []>} : vector<128x5xbf16>, vector<5x32xbf16>, vector<128x32xf32> -> vector<128x32xf32>
    %16 = vector.broadcast %3 : vector<1x32xf32> to vector<128x32xf32>
    %17 = arith.mulf %15, %16 : vector<128x32xf32>
    %18 = vector.broadcast %4 : vector<1x32xf32> to vector<128x32xf32>
    %19 = arith.addf %17, %18 : vector<128x32xf32>
    %cst_8 = arith.constant 0.000000e+00 : f32
    %20 = vector.broadcast %cst_8 : f32 to vector<128x32xf32>
    %21 = arith.maximumf %19, %20 : vector<128x32xf32>
    %22 = vector.shape_cast %21 : vector<128x32xf32> to vector<64x2x32xf32>
    %23 = vector.extract_strided_slice %22 {offsets = [0, 0, 0], sizes = [64, 1, 32], strides = [1, 1, 1]} : vector<64x2x32xf32> to vector<64x1x32xf32>
    %24 = vector.shape_cast %23 : vector<64x1x32xf32> to vector<64x32xf32>
    %25 = vector.extract_strided_slice %22 {offsets = [0, 1, 0], sizes = [64, 1, 32], strides = [1, 1, 1]} : vector<64x2x32xf32> to vector<64x1x32xf32>
    %26 = vector.shape_cast %25 : vector<64x1x32xf32> to vector<64x32xf32>
    %27 = arith.maximumf %24, %26 : vector<64x32xf32>
    %28 = vector.shape_cast %27 : vector<64x32xf32> to vector<8x8x32xf32>
    %c0_9 = arith.constant 0 : index
    %c0_10 = arith.constant 0 : index
    %29 = vector.load %arg5[%c0_9, %c0_10] : memref<96x64xbf16, #tpu.memory_space<vmem>>, vector<96x64xbf16>
    %c0_11 = arith.constant 0 : index
    %c0_12 = arith.constant 0 : index
    %30 = vector.load %arg6[%c0_11, %c0_12] : memref<1x64xf32, #tpu.memory_space<vmem>>, vector<1x64xf32>
    %c0_13 = arith.constant 0 : index
    %c0_14 = arith.constant 0 : index
    %31 = vector.load %arg7[%c0_13, %c0_14] : memref<1x64xf32, #tpu.memory_space<vmem>>, vector<1x64xf32>
    %32 = arith.truncf %28 : vector<8x8x32xf32> to vector<8x8x32xbf16>
    %cst_15 = arith.constant 0.000000e+00 : bf16
    %33 = vector.broadcast %cst_15 : bf16 to vector<8x1x32xbf16>
    %34 = tpu.concatenate %33, %32, %33 in 1 : vector<8x1x32xbf16>, vector<8x8x32xbf16>, vector<8x1x32xbf16> -> vector<8x10x32xbf16>
    %35 = vector.extract_strided_slice %34 {offsets = [0, 0, 0], sizes = [8, 8, 32], strides = [1, 1, 1]} : vector<8x10x32xbf16> to vector<8x8x32xbf16>
    %36 = vector.extract_strided_slice %34 {offsets = [0, 1, 0], sizes = [8, 8, 32], strides = [1, 1, 1]} : vector<8x10x32xbf16> to vector<8x8x32xbf16>
    %37 = vector.extract_strided_slice %34 {offsets = [0, 2, 0], sizes = [8, 8, 32], strides = [1, 1, 1]} : vector<8x10x32xbf16> to vector<8x8x32xbf16>
    %38 = tpu.concatenate %35, %36, %37 in 2 : vector<8x8x32xbf16>, vector<8x8x32xbf16>, vector<8x8x32xbf16> -> vector<8x8x96xbf16>
    %39 = vector.shape_cast %38 : vector<8x8x96xbf16> to vector<64x96xbf16>
    %cst_16 = arith.constant dense<0.000000e+00> : vector<64x64xf32>
    %40 = tpu.matmul %39, %29, %cst_16 {dimension_numbers = #tpu.dot_dimension_numbers<[1], [0], [0], [1], [0, 0, 1, 1], [], []>} : vector<64x96xbf16>, vector<96x64xbf16>, vector<64x64xf32> -> vector<64x64xf32>
    %41 = vector.broadcast %30 : vector<1x64xf32> to vector<64x64xf32>
    %42 = arith.mulf %40, %41 : vector<64x64xf32>
    %43 = vector.broadcast %31 : vector<1x64xf32> to vector<64x64xf32>
    %44 = arith.addf %42, %43 : vector<64x64xf32>
    %cst_17 = arith.constant 0.000000e+00 : f32
    %45 = vector.broadcast %cst_17 : f32 to vector<64x64xf32>
    %46 = arith.maximumf %44, %45 : vector<64x64xf32>
    %47 = vector.shape_cast %46 : vector<64x64xf32> to vector<32x2x64xf32>
    %48 = vector.extract_strided_slice %47 {offsets = [0, 0, 0], sizes = [32, 1, 64], strides = [1, 1, 1]} : vector<32x2x64xf32> to vector<32x1x64xf32>
    %49 = vector.shape_cast %48 : vector<32x1x64xf32> to vector<32x64xf32>
    %50 = vector.extract_strided_slice %47 {offsets = [0, 1, 0], sizes = [32, 1, 64], strides = [1, 1, 1]} : vector<32x2x64xf32> to vector<32x1x64xf32>
    %51 = vector.shape_cast %50 : vector<32x1x64xf32> to vector<32x64xf32>
    %52 = arith.maximumf %49, %51 : vector<32x64xf32>
    %53 = vector.shape_cast %52 : vector<32x64xf32> to vector<8x4x64xf32>
    %c0_18 = arith.constant 0 : index
    %c0_19 = arith.constant 0 : index
    %54 = vector.load %arg8[%c0_18, %c0_19] : memref<192x128xbf16, #tpu.memory_space<vmem>>, vector<192x128xbf16>
    %c0_20 = arith.constant 0 : index
    %c0_21 = arith.constant 0 : index
    %55 = vector.load %arg9[%c0_20, %c0_21] : memref<1x128xf32, #tpu.memory_space<vmem>>, vector<1x128xf32>
    %c0_22 = arith.constant 0 : index
    %c0_23 = arith.constant 0 : index
    %56 = vector.load %arg10[%c0_22, %c0_23] : memref<1x128xf32, #tpu.memory_space<vmem>>, vector<1x128xf32>
    %57 = arith.truncf %53 : vector<8x4x64xf32> to vector<8x4x64xbf16>
    %cst_24 = arith.constant 0.000000e+00 : bf16
    %58 = vector.broadcast %cst_24 : bf16 to vector<8x1x64xbf16>
    %59 = tpu.concatenate %58, %57, %58 in 1 : vector<8x1x64xbf16>, vector<8x4x64xbf16>, vector<8x1x64xbf16> -> vector<8x6x64xbf16>
    %60 = vector.extract_strided_slice %59 {offsets = [0, 0, 0], sizes = [8, 4, 64], strides = [1, 1, 1]} : vector<8x6x64xbf16> to vector<8x4x64xbf16>
    %61 = vector.extract_strided_slice %59 {offsets = [0, 1, 0], sizes = [8, 4, 64], strides = [1, 1, 1]} : vector<8x6x64xbf16> to vector<8x4x64xbf16>
    %62 = vector.extract_strided_slice %59 {offsets = [0, 2, 0], sizes = [8, 4, 64], strides = [1, 1, 1]} : vector<8x6x64xbf16> to vector<8x4x64xbf16>
    %63 = tpu.concatenate %60, %61, %62 in 2 : vector<8x4x64xbf16>, vector<8x4x64xbf16>, vector<8x4x64xbf16> -> vector<8x4x192xbf16>
    %64 = vector.shape_cast %63 : vector<8x4x192xbf16> to vector<32x192xbf16>
    %cst_25 = arith.constant dense<0.000000e+00> : vector<32x128xf32>
    %65 = tpu.matmul %64, %54, %cst_25 {dimension_numbers = #tpu.dot_dimension_numbers<[1], [0], [0], [1], [0, 0, 1, 1], [], []>} : vector<32x192xbf16>, vector<192x128xbf16>, vector<32x128xf32> -> vector<32x128xf32>
    %66 = vector.broadcast %55 : vector<1x128xf32> to vector<32x128xf32>
    %67 = arith.mulf %65, %66 : vector<32x128xf32>
    %68 = vector.broadcast %56 : vector<1x128xf32> to vector<32x128xf32>
    %69 = arith.addf %67, %68 : vector<32x128xf32>
    %cst_26 = arith.constant 0.000000e+00 : f32
    %70 = vector.broadcast %cst_26 : f32 to vector<32x128xf32>
    %71 = arith.maximumf %69, %70 : vector<32x128xf32>
    %72 = vector.shape_cast %71 : vector<32x128xf32> to vector<16x2x128xf32>
    %73 = vector.extract_strided_slice %72 {offsets = [0, 0, 0], sizes = [16, 1, 128], strides = [1, 1, 1]} : vector<16x2x128xf32> to vector<16x1x128xf32>
    %74 = vector.shape_cast %73 : vector<16x1x128xf32> to vector<16x128xf32>
    %75 = vector.extract_strided_slice %72 {offsets = [0, 1, 0], sizes = [16, 1, 128], strides = [1, 1, 1]} : vector<16x2x128xf32> to vector<16x1x128xf32>
    %76 = vector.shape_cast %75 : vector<16x1x128xf32> to vector<16x128xf32>
    %77 = arith.maximumf %74, %76 : vector<16x128xf32>
    %78 = vector.shape_cast %77 : vector<16x128xf32> to vector<8x2x128xf32>
    %79 = arith.truncf %78 : vector<8x2x128xf32> to vector<8x2x128xbf16>
    %cst_27 = arith.constant 0.000000e+00 : f32
    %80 = vector.broadcast %cst_27 : f32 to vector<8x64xf32>
    %81 = vector.extract_strided_slice %79 {offsets = [0, 0, 0], sizes = [8, 1, 128], strides = [1, 1, 1]} : vector<8x2x128xbf16> to vector<8x1x128xbf16>
    %82 = vector.shape_cast %81 : vector<8x1x128xbf16> to vector<8x128xbf16>
    %c0_28 = arith.constant 0 : index
    %c0_29 = arith.constant 0 : index
    %c0_30 = arith.constant 0 : index
    %83 = vector.load %arg11[%c0_28, %c0_29, %c0_30] : memref<2x128x64xbf16, #tpu.memory_space<vmem>>, vector<1x128x64xbf16>
    %84 = vector.shape_cast %83 : vector<1x128x64xbf16> to vector<128x64xbf16>
    %cst_31 = arith.constant dense<0.000000e+00> : vector<8x64xf32>
    %85 = tpu.matmul %82, %84, %cst_31 {dimension_numbers = #tpu.dot_dimension_numbers<[1], [0], [0], [1], [0, 0, 1, 1], [], []>} : vector<8x128xbf16>, vector<128x64xbf16>, vector<8x64xf32> -> vector<8x64xf32>
    %86 = arith.addf %80, %85 : vector<8x64xf32>
    %87 = vector.extract_strided_slice %79 {offsets = [0, 1, 0], sizes = [8, 1, 128], strides = [1, 1, 1]} : vector<8x2x128xbf16> to vector<8x1x128xbf16>
    %88 = vector.shape_cast %87 : vector<8x1x128xbf16> to vector<8x128xbf16>
    %c1 = arith.constant 1 : index
    %c0_32 = arith.constant 0 : index
    %c0_33 = arith.constant 0 : index
    %89 = vector.load %arg11[%c1, %c0_32, %c0_33] : memref<2x128x64xbf16, #tpu.memory_space<vmem>>, vector<1x128x64xbf16>
    %90 = vector.shape_cast %89 : vector<1x128x64xbf16> to vector<128x64xbf16>
    %cst_34 = arith.constant dense<0.000000e+00> : vector<8x64xf32>
    %91 = tpu.matmul %88, %90, %cst_34 {dimension_numbers = #tpu.dot_dimension_numbers<[1], [0], [0], [1], [0, 0, 1, 1], [], []>} : vector<8x128xbf16>, vector<128x64xbf16>, vector<8x64xf32> -> vector<8x64xf32>
    %92 = arith.addf %86, %91 : vector<8x64xf32>
    %c0_35 = arith.constant 0 : index
    %c0_36 = arith.constant 0 : index
    %93 = vector.load %arg12[%c0_35, %c0_36] : memref<1x64xf32, #tpu.memory_space<vmem>>, vector<1x64xf32>
    %94 = vector.broadcast %93 : vector<1x64xf32> to vector<8x64xf32>
    %95 = arith.mulf %92, %94 : vector<8x64xf32>
    %c0_37 = arith.constant 0 : index
    %c0_38 = arith.constant 0 : index
    %96 = vector.load %arg13[%c0_37, %c0_38] : memref<1x64xf32, #tpu.memory_space<vmem>>, vector<1x64xf32>
    %97 = vector.broadcast %96 : vector<1x64xf32> to vector<8x64xf32>
    %98 = arith.addf %95, %97 : vector<8x64xf32>
    %cst_39 = arith.constant 0.000000e+00 : f32
    %99 = vector.broadcast %cst_39 : f32 to vector<8x64xf32>
    %100 = arith.maximumf %98, %99 : vector<8x64xf32>
    %101 = arith.truncf %100 : vector<8x64xf32> to vector<8x64xbf16>
    %c0_40 = arith.constant 0 : index
    %c0_41 = arith.constant 0 : index
    %102 = vector.load %arg14[%c0_40, %c0_41] : memref<64x32xbf16, #tpu.memory_space<vmem>>, vector<64x32xbf16>
    %cst_42 = arith.constant dense<0.000000e+00> : vector<8x32xf32>
    %103 = tpu.matmul %101, %102, %cst_42 {dimension_numbers = #tpu.dot_dimension_numbers<[1], [0], [0], [1], [0, 0, 1, 1], [], []>} : vector<8x64xbf16>, vector<64x32xbf16>, vector<8x32xf32> -> vector<8x32xf32>
    %c0_43 = arith.constant 0 : index
    %c0_44 = arith.constant 0 : index
    %104 = vector.load %arg15[%c0_43, %c0_44] : memref<1x32xf32, #tpu.memory_space<vmem>>, vector<1x32xf32>
    %105 = vector.broadcast %104 : vector<1x32xf32> to vector<8x32xf32>
    %106 = arith.mulf %103, %105 : vector<8x32xf32>
    %c0_45 = arith.constant 0 : index
    %c0_46 = arith.constant 0 : index
    %107 = vector.load %arg16[%c0_45, %c0_46] : memref<1x32xf32, #tpu.memory_space<vmem>>, vector<1x32xf32>
    %108 = vector.broadcast %107 : vector<1x32xf32> to vector<8x32xf32>
    %109 = arith.addf %106, %108 : vector<8x32xf32>
    %cst_47 = arith.constant 0.000000e+00 : f32
    %110 = vector.broadcast %cst_47 : f32 to vector<8x32xf32>
    %111 = arith.maximumf %109, %110 : vector<8x32xf32>
    %112 = arith.truncf %111 : vector<8x32xf32> to vector<8x32xbf16>
    %c0_48 = arith.constant 0 : index
    %c0_49 = arith.constant 0 : index
    %113 = vector.load %arg17[%c0_48, %c0_49] : memref<32x128xbf16, #tpu.memory_space<vmem>>, vector<32x128xbf16>
    %cst_50 = arith.constant dense<0.000000e+00> : vector<8x128xf32>
    %114 = tpu.matmul %112, %113, %cst_50 {dimension_numbers = #tpu.dot_dimension_numbers<[1], [0], [0], [1], [0, 0, 1, 1], [], []>} : vector<8x32xbf16>, vector<32x128xbf16>, vector<8x128xf32> -> vector<8x128xf32>
    %c0_51 = arith.constant 0 : index
    %c0_52 = arith.constant 0 : index
    %115 = vector.load %arg18[%c0_51, %c0_52] : memref<1x128xf32, #tpu.memory_space<vmem>>, vector<1x128xf32>
    %116 = vector.broadcast %115 : vector<1x128xf32> to vector<8x128xf32>
    %117 = arith.addf %114, %116 : vector<8x128xf32>
    %c0_53 = arith.constant 0 : index
    %c0_54 = arith.constant 0 : index
    %118 = vector.load %arg19[%c0_53, %c0_54] : memref<8x128xf32, #tpu.memory_space<vmem>>, vector<8x128xf32>
    tpu.vector_store %arg19[%c0_53, %c0_54], %117 {strides = array<i32>} : memref<8x128xf32, #tpu.memory_space<vmem>>, vector<8x128xf32>,
    return
  }
  func.func @transform_0(%arg0: i32) -> (i32, i32) {
    %c0_i32 = arith.constant 0 : i32
    %c0_i32_0 = arith.constant 0 : i32
    return %arg0, %c0_i32 : i32, i32
  }
  func.func @transform_1(%arg0: i32) -> (i32, i32) {
    %c0_i32 = arith.constant 0 : i32
    %c0_i32_0 = arith.constant 0 : i32
    %c0_i32_1 = arith.constant 0 : i32
    return %c0_i32, %c0_i32_0 : i32, i32
  }
  func.func @transform_2(%arg0: i32) -> (i32, i32) {
    %c0_i32 = arith.constant 0 : i32
    %c0_i32_0 = arith.constant 0 : i32
    %c0_i32_1 = arith.constant 0 : i32
    return %c0_i32, %c0_i32_0 : i32, i32
  }
  func.func @transform_3(%arg0: i32) -> (i32, i32) {
    %c0_i32 = arith.constant 0 : i32
    %c0_i32_0 = arith.constant 0 : i32
    %c0_i32_1 = arith.constant 0 : i32
    return %c0_i32, %c0_i32_0 : i32, i32
  }
  func.func @transform_4(%arg0: i32) -> (i32, i32) {
    %c0_i32 = arith.constant 0 : i32
    %c0_i32_0 = arith.constant 0 : i32
    %c0_i32_1 = arith.constant 0 : i32
    return %c0_i32, %c0_i32_0 : i32, i32
  }
  func.func @transform_5(%arg0: i32) -> (i32, i32) {
    %c0_i32 = arith.constant 0 : i32
    %c0_i32_0 = arith.constant 0 : i32
    %c0_i32_1 = arith.constant 0 : i32
    return %c0_i32, %c0_i32_0 : i32, i32
  }
  func.func @transform_6(%arg0: i32) -> (i32, i32) {
    %c0_i32 = arith.constant 0 : i32
    %c0_i32_0 = arith.constant 0 : i32
    %c0_i32_1 = arith.constant 0 : i32
    return %c0_i32, %c0_i32_0 : i32, i32
  }
  func.func @transform_7(%arg0: i32) -> (i32, i32) {
    %c0_i32 = arith.constant 0 : i32
    %c0_i32_0 = arith.constant 0 : i32
    %c0_i32_1 = arith.constant 0 : i32
    return %c0_i32, %c0_i32_0 : i32, i32
  }
  func.func @transform_8(%arg0: i32) -> (i32, i32) {
    %c0_i32 = arith.constant 0 : i32
    %c0_i32_0 = arith.constant 0 : i32
    %c0_i32_1 = arith.constant 0 : i32
    return %c0_i32, %c0_i32_0 : i32, i32
  }
  func.func @transform_9(%arg0: i32) -> (i32, i32) {
    %c0_i32 = arith.constant 0 : i32
    %c0_i32_0 = arith.constant 0 : i32
    %c0_i32_1 = arith.constant 0 : i32
    return %c0_i32, %c0_i32_0 : i32, i32
  }
  func.func @transform_10(%arg0: i32) -> (i32, i32, i32) {
    %c0_i32 = arith.constant 0 : i32
    %c0_i32_0 = arith.constant 0 : i32
    %c0_i32_1 = arith.constant 0 : i32
    %c0_i32_2 = arith.constant 0 : i32
    return %c0_i32, %c0_i32_0, %c0_i32_1 : i32, i32, i32
  }
  func.func @transform_11(%arg0: i32) -> (i32, i32) {
    %c0_i32 = arith.constant 0 : i32
    %c0_i32_0 = arith.constant 0 : i32
    %c0_i32_1 = arith.constant 0 : i32
    return %c0_i32, %c0_i32_0 : i32, i32
  }
  func.func @transform_12(%arg0: i32) -> (i32, i32) {
    %c0_i32 = arith.constant 0 : i32
    %c0_i32_0 = arith.constant 0 : i32
    %c0_i32_1 = arith.constant 0 : i32
    return %c0_i32, %c0_i32_0 : i32, i32
  }
  func.func @transform_13(%arg0: i32) -> (i32, i32) {
    %c0_i32 = arith.constant 0 : i32
    %c0_i32_0 = arith.constant 0 : i32
    %c0_i32_1 = arith.constant 0 : i32
    return %c0_i32, %c0_i32_0 : i32, i32
  }
  func.func @transform_14(%arg0: i32) -> (i32, i32) {
    %c0_i32 = arith.constant 0 : i32
    %c0_i32_0 = arith.constant 0 : i32
    %c0_i32_1 = arith.constant 0 : i32
    return %c0_i32, %c0_i32_0 : i32, i32
  }
  func.func @transform_15(%arg0: i32) -> (i32, i32) {
    %c0_i32 = arith.constant 0 : i32
    %c0_i32_0 = arith.constant 0 : i32
    %c0_i32_1 = arith.constant 0 : i32
    return %c0_i32, %c0_i32_0 : i32, i32
  }
  func.func @transform_16(%arg0: i32) -> (i32, i32) {
    %c0_i32 = arith.constant 0 : i32
    %c0_i32_0 = arith.constant 0 : i32
    %c0_i32_1 = arith.constant 0 : i32
    return %c0_i32, %c0_i32_0 : i32, i32
  }
  func.func @transform_17(%arg0: i32) -> (i32, i32) {
    %c0_i32 = arith.constant 0 : i32
    %c0_i32_0 = arith.constant 0 : i32
    %c0_i32_1 = arith.constant 0 : i32
    return %c0_i32, %c0_i32_0 : i32, i32
  }
  func.func @transform_18(%arg0: i32) -> (i32, i32) {
    %c0_i32 = arith.constant 0 : i32
    %c0_i32_0 = arith.constant 0 : i32
    return %arg0, %c0_i32 : i32, i32
  }
}

</mosaic_0001>

<bundles_post_ra>
// kernel: tpu_custom_call.1
= control target key start
LH: loop header
LB: loop body
LE: loop exit
PB: predicated region body
PF: predicated region fallthrough
CT: control target
= control target key end

     0   :  { %s5199_s0 = inlined_call_operand.vmem [shape: f32[8,16], index: 0, kind: input, shape index: {}]   ;;  %s5200_s1 = inlined_call_operand.vmem [shape: bf16[5,32], index: 1, kind: input, shape index: {}]   ;;  %s5201_s2 = inlined_call_operand.vmem [shape: f32[1,32], index: 2, kind: input, shape index: {}]   ;;  %s5202_s3 = inlined_call_operand.vmem [shape: f32[1,32], index: 3, kind: input, shape index: {}]   ;;  %s5203_s4 = inlined_call_operand.vmem [shape: bf16[96,64], index: 4, kind: input, shape index: {}]   ;;  %s5204_s5 = inlined_call_operand.vmem [shape: f32[1,64], index: 5, kind: input, shape index: {}]   ;;  %s5205_s6 = inlined_call_operand.vmem [shape: f32[1,64], index: 6, kind: input, shape index: {}]   ;;  %s5206_s7 = inlined_call_operand.vmem [shape: bf16[192,128], index: 7, kind: input, shape index: {}]   ;;  %s5207_s8 = inlined_call_operand.vmem [shape: f32[1,128], index: 8, kind: input, shape index: {}]   ;;  %s5208_s9 = inlined_call_operand.vmem [shape: f32[1,128], index: 9, kind: input, shape index: {}]   ;;  %s5209_s10 = inlined_call_operand.vmem [shape: bf16[2,128,64], index: 10, kind: input, shape index: {}]   ;;  %s5210_s11 = inlined_call_operand.vmem [shape: f32[1,64], index: 11, kind: input, shape index: {}]   ;;  %s5211_s12 = inlined_call_operand.vmem [shape: f32[1,64], index: 12, kind: input, shape index: {}]   ;;  %s5212_s13 = inlined_call_operand.vmem [shape: bf16[64,32], index: 13, kind: input, shape index: {}]   ;;  %s5213_s14 = inlined_call_operand.vmem [shape: f32[1,32], index: 14, kind: input, shape index: {}]   ;;  %s5214_s15 = inlined_call_operand.vmem [shape: f32[1,32], index: 15, kind: input, shape index: {}]   ;;  %s5215_s16 = inlined_call_operand.vmem [shape: bf16[32,128], index: 16, kind: input, shape index: {}]   ;;  %s5216_s17 = inlined_call_operand.vmem [shape: f32[1,128], index: 17, kind: input, shape index: {}]   ;;  %s5217_s18 = inlined_call_operand.hbm [shape: f32[8,128], index: 18, kind: output, shape index: {}]  }
   0x1   :  { %5218 = sst [smem:[#allocation5_spill]] %s5199_s0 }
   0x2   :  { %5219 = sst [smem:[#allocation6_spill]] %s5200_s1 }
   0x3   :  { %5220 = sst [smem:[#allocation7_spill]] %s5201_s2 }
   0x4   :  { %v62_v0 = vlaneseq  ;;  %s5221_s29 = sld [smem:[#allocation5_spill]] }
   0x6   :  { %v4054_v2 = vshrl.u32 %v62_v0, 7 }
   0x8   :  { %v75_v3 = vsub.s32 1, %v4054_v2  ;;  %v64_v4 = vsub.s32 0, %v4054_v2  ;;  %v86_v7 = vsub.s32 2, %v4054_v2  ;;  %v97_v8 = vsub.s32 3, %v4054_v2 }
   0x9   :  { %v108_v10 = vsub.s32 4, %v4054_v2  ;;  %v119_v11 = vsub.s32 5, %v4054_v2  ;;  %v130_v12 = vsub.s32 6, %v4054_v2  ;;  %v141_v13 = vsub.s32 7, %v4054_v2 }
   0xa   :  { %v61_v1 = vld [vmem:[%s5221_s29] sm:$0xff] }
   0xb   :  { %v76_v5 = vrot.slane %v61_v1, %v75_v3  ;;  %v65_v6 = vrot.slane %v61_v1, %v64_v4  ;;  %v87_v9 = vrot.slane %v61_v1, %v86_v7  ;;  %v98_v14 = vrot.slane %v61_v1, %v97_v8 }
   0xc   :  { %v109_v15 = vrot.slane %v61_v1, %v108_v10  ;;  %v120_v16 = vrot.slane %v61_v1, %v119_v11  ;;  %v131_v17 = vrot.slane %v61_v1, %v130_v12  ;;  %v142_v18 = vrot.slane %v61_v1, %v141_v13 }
   0xd   :  { %78 = vbcast.lane.b32.xlu1 %v76_v5, 256  ;;  %67 = vbcast.lane.b32.xlu0 %v65_v6, 256 }
  0x11   :  { %82 = vbcast.lane.b32.xlu1 %v76_v5, 264  ;;  %71 = vbcast.lane.b32.xlu0 %v65_v6, 264 }
  0x15   :  { %93 = vbcast.lane.b32.xlu1 %v87_v9, 264  ;;  %89 = vbcast.lane.b32.xlu0 %v87_v9, 256 }
  0x19   :  { %104 = vbcast.lane.b32.xlu1 %v98_v14, 264  ;;  %100 = vbcast.lane.b32.xlu0 %v98_v14, 256 }
  0x1d   :  { %115 = vbcast.lane.b32.xlu1 %v109_v15, 264  ;;  %111 = vbcast.lane.b32.xlu0 %v109_v15, 256 }
  0x21   :  { %126 = vbcast.lane.b32.xlu1 %v120_v16, 264  ;;  %122 = vbcast.lane.b32.xlu0 %v120_v16, 256 }
  0x25   :  { %137 = vbcast.lane.b32.xlu1 %v131_v17, 264  ;;  %133 = vbcast.lane.b32.xlu0 %v131_v17, 256 }
  0x26   :  { %23 = vsyncpa [#allocation3], 0  ;;  %vm177_vm0 = vcmask 1040384   ;;  %vm316_vm1 = vcmask 1046528   ;;  %s3944_s30 = smov 2   ;;  %vm446_vm2 = vcmask 1045504  }
  0x27   :  { %s3945_s0 = smov 4   ;;  %vm203_vm3 = vsmask.f32 7424  ;;  %vm357_vm4 = vsmask.f32 6400  ;;  %s3946_s19 = smov 1  }
  0x28   :  { %s3947_s1 = smov 3   ;;  %vm572_vm5 = vcmask 1041408   ;;  %s5222_s22 = sld [smem:[#allocation6_spill]]  ;;  %vm573_vm6 = vcmask 1042432   ;;  %vm487_vm7 = vcmask 7168   ;;  %vm504_vm8 = vcmask 15360  }
  0x29   :  { %148 = vbcast.lane.b32.xlu1 %v142_v18, 264  ;;  %144 = vbcast.lane.b32.xlu0 %v142_v18, 256  ;;  %vm521_vm9 = vcmask 23552   ;;  %vm538_vm10 = vcmask 31744   ;;  %vm555_vm11 = vcmask 39936   ;;  %s5223_s24 = sld [smem:[#allocation7_spill]] }
  0x2a   :  { %vm1552_vm12 = vcmask 1042434   ;;  %vm1555_vm13 = vcmask 1043459   ;;  %vm1558_vm14 = vcmask 1044484   ;;  %vm1561_vm15 = vcmask 1045509   ;;  %s3955_s25 = smov [#allocation2]  }
  0x7f   :  { %v79_v19 = vpop.permute.xlu1 %78  ;;  %v68_v20 = vpop.permute.xlu0 %67 }
  0x83   :  { %v83_v21 = vpop.permute.xlu1 %82  ;;  %v72_v22 = vpop.permute.xlu0 %71 }
  0x84   :  { %v154_v23 = vpack.c.bf16 %v83_v21, %v79_v19  ;;  %v153_v24 = vpack.c.bf16 %v72_v22, %v68_v20 }
  0x86   :  { %v170_v25 = vrot.slane %v154_v23, 7  ;;  %v169_v26 = vrot.slane %v153_v24, 7 }
  0x87   :  { %v94_v27 = vpop.permute.xlu1 %93  ;;  %v90_v28 = vpop.permute.xlu0 %89 }
  0x88   :  { %v4065_v29 = vsel %vm177_vm0, 0, %v170_v25  ;;  %v4068_v30 = vsel %vm177_vm0, %v170_v25, 0  ;;  %v4071_v31 = vsel %vm177_vm0, 0, %v169_v26  ;;  %v4074_v32 = vsel %vm177_vm0, %v169_v26, 0 }
  0x89   :  { %v155_v33 = vpack.c.bf16 %v94_v27, %v90_v28  ;;  %v320_v34 = vrot.slane %v4065_v29, 1  ;;  %v321_v37 = vrot.slane %v4068_v30, 1  ;;  %v317_v38 = vrot.slane %v4071_v31, 1 }
  0x8a   :  { %v318_v39 = vrot.slane %v4074_v32, 1  ;;  %v450_v42 = vrot.slane %v4065_v29, 2  ;;  %v451_v45 = vrot.slane %v4068_v30, 2  ;;  %v447_v46 = vrot.slane %v4071_v31, 2 }
  0x8b   :  { %v105_v35 = vpop.permute.xlu1 %104  ;;  %v101_v36 = vpop.permute.xlu0 %100  ;;  %v171_v40 = vrot.slane %v155_v33, 7  ;;  %v322_v43 = vsel %vm316_vm1, %v320_v34, %v321_v37  ;;  %v448_v48 = vrot.slane %v4074_v32, 2  ;;  %v216_v24 = vshll.u32 %v4065_v29, 16 }
  0x8c   :  { %v156_v41 = vpack.c.bf16 %v105_v35, %v101_v36  ;;  %v319_v44 = vsel %vm316_vm1, %v317_v38, %v318_v39  ;;  %343 = vrot.lane.b32.xlu1 %v322_v43, %s3944_s30  ;;  %v452_v56 = vsel %vm446_vm2, %v450_v42, %v451_v45  ;;  %v370_v25 = vshrl.u32 %v4068_v30, 16 }
  0x8d   :  { %341 = vrot.lane.b32.xlu0 %v319_v44, %s3944_s30  ;;  %v4089_v49 = vsel %vm177_vm0, 0, %v171_v40  ;;  %v4092_v50 = vsel %vm177_vm0, %v171_v40, 0  ;;  %v449_v57 = vsel %vm446_vm2, %v447_v46, %v448_v48  ;;  %v206_v34 = vshll.u32 %v4071_v31, 16 }
  0x8e   :  { %v172_v47 = vrot.slane %v156_v41, 7  ;;  %v323_v59 = vrot.slane %v4089_v49, 1  ;;  %v324_v60 = vrot.slane %v4092_v50, 1  ;;  %v453_v3 = vrot.slane %v4089_v49, 2 }
  0x8f   :  { %v116_v51 = vpop.permute.xlu1 %115  ;;  %v112_v52 = vpop.permute.xlu0 %111  ;;  %v454_v7 = vrot.slane %v4092_v50, 2  ;;  %v220_v42 = vshll.u32 %v4068_v30, 16  ;;  %v210_v43 = vshll.u32 %v4074_v32, 16  ;;  %v361_v44 = vshrl.u32 %v4074_v32, 16 }
  0x90   :  { %v4095_v53 = vsel %vm177_vm0, 0, %v172_v47  ;;  %v4098_v54 = vsel %vm177_vm0, %v172_v47, 0  ;;  %v157_v55 = vpack.c.bf16 %v116_v51, %v112_v52  ;;  %473 = vrot.lane.b32.xlu1 %v452_v56, %s3945_s0  ;;  %v325_v5 = vsel %vm316_vm1, %v323_v59, %v324_v60 }
  0x91   :  { %471 = vrot.lane.b32.xlu0 %v449_v57, %s3945_s0  ;;  %v326_v61 = vrot.slane %v4095_v53, 1  ;;  %v327_v0 = vrot.slane %v4098_v54, 1  ;;  %v456_v10 = vrot.slane %v4095_v53, 2  ;;  %v457_v11 = vrot.slane %v4098_v54, 2 }
  0x92   :  { %v173_v58 = vrot.slane %v157_v55, 7  ;;  %v455_v17 = vsel %vm446_vm2, %v453_v3, %v454_v7  ;;  %v4156_v46 = vrot.slane %v370_v25, 1  ;;  %v204_v51 = vshrl.u32 %v4071_v31, 16 }
  0x93   :  { %v127_v62 = vpop.permute.xlu1 %126  ;;  %v123_v63 = vpop.permute.xlu0 %122  ;;  %v328_v6 = vsel %vm316_vm1, %v326_v61, %v327_v0  ;;  %v458_v18 = vsel %vm446_vm2, %v456_v10, %v457_v11  ;;  %v208_v55 = vrot.slane %v206_v34, 1  ;;  %v218_v59 = vrot.slane %v216_v24, 1 }
  0x94   :  { %v158_v1 = vpack.c.bf16 %v127_v62, %v123_v63  ;;  %v4110_v4 = vsel %vm177_vm0, 0, %v173_v58  ;;  %v4116_v8 = vsel %vm177_vm0, %v173_v58, 0  ;;  %347 = vrot.lane.b32.xlu1 %v328_v6, %s3944_s30  ;;  %v214_v58 = vshrl.u32 %v4065_v29, 16 }
  0x95   :  { %345 = vrot.lane.b32.xlu0 %v325_v5, %s3944_s30  ;;  %v329_v19 = vrot.slane %v4110_v4, 1  ;;  %v330_v20 = vrot.slane %v4116_v8, 1  ;;  %v459_v28 = vrot.slane %v4110_v4, 2  ;;  %v460_v33 = vrot.slane %v4116_v8, 2 }
  0x96   :  { %v174_v9 = vrot.slane %v158_v1, 7  ;;  %v363_v60 = vrot.slane %v361_v44, 1  ;;  %v226_v61 = vshll.u32 %v4089_v49, 16  ;;  %v379_v62 = vshrl.u32 %v4092_v50, 16 }
  0x97   :  { %v138_v12 = vpop.permute.xlu1 %137  ;;  %v134_v13 = vpop.permute.xlu0 %133  ;;  %v331_v39 = vsel %vm316_vm1, %v329_v19, %v330_v20  ;;  %v461_v47 = vsel %vm446_vm2, %v459_v28, %v460_v33  ;;  %v236_v0 = vshll.u32 %v4095_v53, 16  ;;  %v358_v1 = vrot.slane %v204_v51, 1 }
  0x98   :  { %v4123_v14 = vsel %vm177_vm0, 0, %v174_v9  ;;  %v4126_v15 = vsel %vm177_vm0, %v174_v9, 0  ;;  %v159_v16 = vpack.c.bf16 %v138_v12, %v134_v13  ;;  %477 = vrot.lane.b32.xlu1 %v458_v18, %s3945_s0  ;;  %v359_v3 = vrot.slane %v206_v34, 2 }
  0x99   :  { %475 = vrot.lane.b32.xlu0 %v455_v17, %s3945_s0  ;;  %v332_v22 = vrot.slane %v4123_v14, 1  ;;  %v333_v23 = vrot.slane %v4126_v15, 1  ;;  %v462_v40 = vrot.slane %v4123_v14, 2  ;;  %v463_v41 = vrot.slane %v4126_v15, 2 }
  0x9a   :  { %v175_v21 = vrot.slane %v159_v16, 7  ;;  %v364_v5 = vrot.slane %v210_v43, 2  ;;  %v388_v6 = vshrl.u32 %v4098_v54, 16  ;;  %v209_v10 = vor.u32 %v208_v55, %v204_v51 }
  0x9b   :  { %v149_v26 = vpop.permute.xlu1 %148  ;;  %v145_v27 = vpop.permute.xlu0 %144  ;;  %v334_v37 = vsel %vm316_vm1, %v332_v22, %v333_v23  ;;  %v464_v56 = vsel %vm446_vm2, %v462_v40, %v463_v41  ;;  %v219_v11 = vor.u32 %v218_v59, %v214_v58  ;;  %v367_v12 = vrot.slane %v214_v58, 1 }
  0x9c   :  { %v4142_v35 = vsel %vm177_vm0, 0, %v175_v21  ;;  %v160_v36 = vpack.c.bf16 %v149_v26, %v145_v27  ;;  %v4146_v38 = vsel %vm177_vm0, %v175_v21, 0  ;;  %351 = vrot.lane.b32.xlu1 %v334_v37, %s3944_s30  ;;  %v368_v13 = vrot.slane %v216_v24, 2 }
  0x9d   :  { %349 = vrot.lane.b32.xlu0 %v331_v39, %s3944_s30  ;;  %v335_v48 = vrot.slane %v4142_v35, 1  ;;  %v336_v32 = vrot.slane %v4146_v38, 1  ;;  %v373_v16 = vrot.slane %v220_v42, 2  ;;  %v230_v17 = vshll.u32 %v4092_v50, 16 }
  0x9e   :  { %v176_v45 = vrot.slane %v160_v36, 7  ;;  %v240_v18 = vshll.u32 %v4098_v54, 16  ;;  %v212_v19 = vrot.slane %v210_v43, 1  ;;  %v222_v20 = vrot.slane %v220_v42, 1 }
  0x9f   :  { %v337_v7 = vsel %vm316_vm1, %v335_v48, %v336_v32  ;;  %v360_v21 = vor.u32 %v359_v3, %v358_v1  ;;  %v365_v22 = vor.u32 %v364_v5, %v363_v60  ;;  %v224_v23 = vshrl.u32 %v4089_v49, 16 }
  0xa0   :  { %v4162_v30 = vsel %vm177_vm0, 0, %v176_v45  ;;  %v4165_v52 = vsel %vm177_vm0, %v176_v45, 0  ;;  %481 = vrot.lane.b32.xlu1 %v464_v56, %s3945_s0  ;;  %v228_v25 = vrot.slane %v226_v61, 1  ;;  %v381_v26 = vrot.slane %v379_v62, 1 }
  0xa1   :  { %v338_v57 = vrot.slane %v4162_v30, 1  ;;  %479 = vrot.lane.b32.xlu0 %v461_v47, %s3945_s0  ;;  %v339_v63 = vrot.slane %v4165_v52, 1  ;;  %v390_v27 = vrot.slane %v388_v6, 1  ;;  %v234_v24 = vshrl.u32 %v4095_v53, 16 }
  0xa2   :  { %v238_v28 = vrot.slane %v236_v0, 1  ;;  %v213_v50 = vsel %vm203_vm3, %v209_v10, %v212_v19  ;;  %v223_v54 = vsel %vm203_vm3, %v219_v11, %v222_v20  ;;  %v369_v33 = vor.u32 %v368_v13, %v367_v12 }
  0xa3   :  { %v340_v9 = vsel %vm316_vm1, %v338_v57, %v339_v63  ;;  %v374_v34 = vor.u32 %v373_v16, %v4156_v46  ;;  %v246_v36 = vshll.u32 %v4110_v4, 16  ;;  %v397_v37 = vshrl.u32 %v4116_v8, 16 }
  0xa4   :  { %355 = vrot.lane.b32.xlu1 %v340_v9, %s3944_s30  ;;  %v256_v39 = vshll.u32 %v4123_v14, 16  ;;  %v406_v40 = vshrl.u32 %v4126_v15, 16  ;;  %v366_v41 = vsel %vm357_vm4, %v360_v21, %v365_v22  ;;  %v229_v42 = vor.u32 %v228_v25, %v224_v23 }
  0xa5   :  { %353 = vrot.lane.b32.xlu0 %v337_v7, %s3944_s30  ;;  %v232_v43 = vrot.slane %v230_v17, 1  ;;  %v242_v44 = vrot.slane %v240_v18, 1  ;;  %v239_v45 = vor.u32 %v238_v28, %v234_v24  ;;  %v376_v46 = vrot.slane %v224_v23, 1 }
  0xa6   :  { %v377_v47 = vrot.slane %v226_v61, 2  ;;  %v382_v48 = vrot.slane %v230_v17, 2  ;;  %v375_v51 = vsel %vm357_vm4, %v369_v33, %v374_v34  ;;  %v385_v32 = vrot.slane %v234_v24, 1 }
  0xa7   :  { %v386_v55 = vrot.slane %v236_v0, 2  ;;  %v391_v56 = vrot.slane %v240_v18, 2  ;;  %v250_v57 = vshll.u32 %v4116_v8, 16  ;;  %v244_v58 = vshrl.u32 %v4110_v4, 16 }
  0xa8   :  { %286 = vrot.lane.b32.xlu1 %v223_v54, %s3946_s19  ;;  %v399_v59 = vrot.slane %v397_v37, 1  ;;  %v260_v60 = vshll.u32 %v4126_v15, 16  ;;  %v408_v62 = vrot.slane %v406_v40, 1  ;;  %v254_v61 = vshrl.u32 %v4123_v14, 16 }
  0xa9   :  { %284 = vrot.lane.b32.xlu0 %v213_v50, %s3946_s19  ;;  %v233_v63 = vsel %vm203_vm3, %v229_v42, %v232_v43  ;;  %v243_v0 = vsel %vm203_vm3, %v239_v45, %v242_v44  ;;  %v378_v1 = vor.u32 %v377_v47, %v376_v46  ;;  %v383_v3 = vor.u32 %v382_v48, %v381_v26  ;;  %v150_v43 = vld [vmem:[%s5222_s22] sm:$0x7]  ;;  %s3950_s22 = smov 64  }
  0xaa   :  { %v387_v8 = vor.u32 %v386_v55, %v385_v32  ;;  %v392_v5 = vor.u32 %v391_v56, %v390_v27  ;;  %v248_v6 = vrot.slane %v246_v36, 1  ;;  %v258_v7 = vrot.slane %v256_v39, 1 }
  0xab   :  { %v415_v9 = vshrl.u32 %v4146_v38, 16  ;;  %v394_v15 = vrot.slane %v244_v58, 1  ;;  %v395_v10 = vrot.slane %v246_v36, 2  ;;  %v400_v11 = vrot.slane %v250_v57, 2 }
  0xac   :  { %432 = vrot.lane.b32.xlu1 %v375_v51, %s3947_s1  ;;  %v266_v12 = vshll.u32 %v4142_v35, 16  ;;  %v270_v13 = vshll.u32 %v4146_v38, 16  ;;  %v403_v16 = vrot.slane %v254_v61, 1  ;;  %v404_v17 = vrot.slane %v256_v39, 2 }
  0xad   :  { %430 = vrot.lane.b32.xlu0 %v366_v41, %s3947_s1  ;;  %v276_v18 = vshll.u32 %v4162_v30, 16  ;;  %v384_v19 = vsel %vm357_vm4, %v378_v1, %v383_v3  ;;  %v252_v20 = vrot.slane %v250_v57, 1  ;;  %v409_v21 = vrot.slane %v260_v60, 2 }
  0xae   :  { %v393_v22 = vsel %vm357_vm4, %v387_v8, %v392_v5  ;;  %v249_v23 = vor.u32 %v248_v6, %v244_v58  ;;  %v259_v25 = vor.u32 %v258_v7, %v254_v61  ;;  %v262_v26 = vrot.slane %v260_v60, 1 }
  0xaf   :  { %v417_v27 = vrot.slane %v415_v9, 1  ;;  %v424_v24 = vshrl.u32 %v4165_v52, 16  ;;  %v396_v28 = vor.u32 %v395_v10, %v394_v15  ;;  %v401_v50 = vor.u32 %v400_v11, %v399_v59 }
  0xb0   :  { %290 = vrot.lane.b32.xlu1 %v243_v0, %s3946_s19  ;;  %v280_v54 = vshll.u32 %v4165_v52, 16  ;;  %v405_v33 = vor.u32 %v404_v17, %v403_v16  ;;  %v264_v34 = vshrl.u32 %v4142_v35, 16  ;;  %v268_v36 = vrot.slane %v266_v12, 1 }
  0xb1   :  { %288 = vrot.lane.b32.xlu0 %v233_v63, %s3946_s19  ;;  %v410_v37 = vor.u32 %v409_v21, %v408_v62  ;;  %v274_v39 = vshrl.u32 %v4162_v30, 16  ;;  %v278_v40 = vrot.slane %v276_v18, 1  ;;  %v253_v41 = vsel %vm203_vm3, %v249_v23, %v252_v20 }
  0xb2   :  { %v263_v42 = vsel %vm203_vm3, %v259_v25, %v262_v26  ;;  %v426_v44 = vrot.slane %v424_v24, 1  ;;  %v402_v45 = vsel %vm357_vm4, %v396_v28, %v401_v50  ;;  %v272_v46 = vrot.slane %v270_v13, 1 }
  0xb3   :  { %v3948_v47 = vmov 65535   ;;  %v269_v51 = vor.u32 %v268_v36, %v264_v34  ;;  %v282_v32 = vrot.slane %v280_v54, 1  ;;  %v412_v55 = vrot.slane %v264_v34, 1 }
  0xb4   :  { %436 = vrot.lane.b32.xlu1 %v393_v22, %s3947_s1  ;;  %v574_v48 = vsel %vm572_vm5, 4294967295, %v3948_v47  ;;  %v411_v57 = vsel %vm357_vm4, %v405_v33, %v410_v37  ;;  %v279_v58 = vor.u32 %v278_v40, %v274_v39  ;;  %v413_v59 = vrot.slane %v266_v12, 2 }
  0xb5   :  { %434 = vrot.lane.b32.xlu0 %v384_v19, %s3947_s1  ;;  %v575_v56 = vsel %vm573_vm6, %v574_v48, 0  ;;  %v418_v62 = vrot.slane %v270_v13, 2  ;;  %v421_v61 = vrot.slane %v274_v39, 1  ;;  %v422_v63 = vrot.slane %v276_v18, 2 }
  0xb6   :  { %v577_v60 = vand.u32 %v575_v56, %v150_v43  ;;  %v427_v0 = vrot.slane %v280_v54, 2  ;;  %v273_v1 = vsel %vm203_vm3, %v269_v51, %v272_v46  ;;  %v414_v3 = vor.u32 %v413_v59, %v412_v55 }
  0xb7   :  { %v283_v8 = vsel %vm203_vm3, %v279_v58, %v282_v32  ;;  %v419_v5 = vor.u32 %v418_v62, %v417_v27  ;;  %v423_v6 = vor.u32 %v422_v63, %v421_v61  ;;  %v465_v9 = vrot.slane %v4142_v35, 2 }
  0xb8   :  { %294 = vrot.lane.b32.xlu1 %v263_v42, %s3946_s19  ;;  %3766 = vmatprep.subr.bf16.mxu0 %v577_v60  ;;  %v428_v7 = vor.u32 %v427_v0, %v426_v44  ;;  %v466_v15 = vrot.slane %v4146_v38, 2  ;;  %v468_v12 = vrot.slane %v4162_v30, 2  ;;  %v469_v13 = vrot.slane %v4165_v52, 2 }
  0xb9   :  { %292 = vrot.lane.b32.xlu0 %v253_v41, %s3946_s19  ;;  %3767 = vmatpush3.bf16.msra.mxu0 %v577_v60  ;;  %v420_v10 = vsel %vm357_vm4, %v414_v3, %v419_v5  ;;  %vm1564_vm1 = vcmask 1046534   ;;  %vm1677_vm3 = vsmask.f32 256  ;;  %vm1688_vm5 = vsmask.f32 4352 }
  0xba   :  { %v429_v11 = vsel %vm357_vm4, %v423_v6, %v428_v7  ;;  %v467_v16 = vsel %vm446_vm2, %v465_v9, %v466_v15  ;;  %v470_v17 = vsel %vm446_vm2, %v468_v12, %v469_v13  ;;  %vm1567_vm2 = vcmask 1047559  }
  0xbb   :  { %vm1687_vm4 = vcmask 1044480  }
  0xbc   :  { %440 = vrot.lane.b32.xlu1 %v411_v57, %s3947_s1 }
  0xbd   :  { %438 = vrot.lane.b32.xlu0 %v402_v45, %s3947_s1 }
  0xc0   :  { %298 = vrot.lane.b32.xlu1 %v283_v8, %s3946_s19 }
  0xc1   :  { %296 = vrot.lane.b32.xlu0 %v273_v1, %s3946_s19 }
  0xc4   :  { %444 = vrot.lane.b32.xlu1 %v429_v11, %s3947_s1 }
  0xc5   :  { %442 = vrot.lane.b32.xlu0 %v420_v10, %s3947_s1 }
  0xc8   :  { %485 = vrot.lane.b32.xlu1 %v470_v17, %s3945_s0 }
  0xc9   :  { %483 = vrot.lane.b32.xlu0 %v467_v16, %s3945_s0 }
  0xfe   :  { %v344_v38 = vpop.permute.xlu1 %343 }
  0xff   :  { %v342_v18 = vpop.permute.xlu0 %341 }
 0x102   :  { %v474_v19 = vpop.permute.xlu1 %473 }
 0x103   :  { %v472_v20 = vpop.permute.xlu0 %471 }
 0x106   :  { %v348_v21 = vpop.permute.xlu1 %347 }
 0x107   :  { %v346_v22 = vpop.permute.xlu0 %345 }
 0x10a   :  { %v478_v23 = vpop.permute.xlu1 %477 }
 0x10b   :  { %v476_v52 = vpop.permute.xlu0 %475 }
 0x10e   :  { %v352_v25 = vpop.permute.xlu1 %351 }
 0x10f   :  { %v350_v26 = vpop.permute.xlu0 %349 }
 0x112   :  { %v482_v27 = vpop.permute.xlu1 %481 }
 0x113   :  { %v480_v24 = vpop.permute.xlu0 %479 }
 0x116   :  { %v356_v28 = vpop.permute.xlu1 %355 }
 0x117   :  { %v354_v50 = vpop.permute.xlu0 %353 }
 0x11a   :  { %v287_v54 = vpop.permute.xlu1 %286 }
 0x11b   :  { %v285_v33 = vpop.permute.xlu0 %284  ;;  %v491_v34 = vsel %vm487_vm7, %v4065_v29, %v287_v54 }
 0x11c   :  { %v489_v36 = vsel %vm487_vm7, %v4071_v31, %v285_v33  ;;  %v508_v37 = vsel %vm504_vm8, %v491_v34, %v344_v38 }
 0x11d   :  { %v506_v40 = vsel %vm504_vm8, %v489_v36, %v342_v18 }
 0x11e   :  { %v433_v39 = vpop.permute.xlu1 %432 }
 0x11f   :  { %v431_v41 = vpop.permute.xlu0 %430  ;;  %v525_v42 = vsel %vm521_vm9, %v508_v37, %v433_v39 }
 0x120   :  { %v523_v43 = vsel %vm521_vm9, %v506_v40, %v431_v41  ;;  %v542_v29 = vsel %vm538_vm10, %v525_v42, %v474_v19 }
 0x121   :  { %v540_v44 = vsel %vm538_vm10, %v523_v43, %v472_v20  ;;  %v4298_v20 = vld [vmem:[%s5223_s24] ss:$0 sm:$0xff]  ;;  %s3951_s24 = smov 32  }
 0x122   :  { %3768 = vmatprep.mubr.msk.bf16.mxu0 %vm555_vm11, %v540_v44  ;;  %v291_v31 = vpop.permute.xlu1 %290 }
 0x123   :  { %3769 = vmatmul.mubr.msk.bf16.vlgmr.msra.gmra.mrb[0].mxu0 %vm555_vm11, %v542_v29  ;;  %v289_v45 = vpop.permute.xlu0 %288  ;;  %v495_v46 = vsel %vm487_vm7, %v4095_v53, %v291_v31 }
 0x124   :  { %v493_v47 = vsel %vm487_vm7, %v4089_v49, %v289_v45  ;;  %v512_v48 = vsel %vm504_vm8, %v495_v46, %v348_v21 }
 0x125   :  { %v510_v32 = vsel %vm504_vm8, %v493_v47, %v346_v22  ;;  %v4303_v22 = vld [vmem:[%s5202_s3] ss:$0 sm:$0xff] }
 0x126   :  { %v437_v51 = vpop.permute.xlu1 %436 }
 0x127   :  { %v435_v55 = vpop.permute.xlu0 %434  ;;  %v529_v56 = vsel %vm521_vm9, %v512_v48, %v437_v51 }
 0x128   :  { %v527_v57 = vsel %vm521_vm9, %v510_v32, %v435_v55  ;;  %v546_v59 = vsel %vm538_vm10, %v529_v56, %v478_v23 }
 0x129   :  { %v544_v58 = vsel %vm538_vm10, %v527_v57, %v476_v52 }
 0x12a   :  { %3772 = vmatprep.mubr.msk.bf16.mxu0 %vm555_vm11, %v544_v58  ;;  %v295_v53 = vpop.permute.xlu1 %294 }
 0x12b   :  { %3773 = vmatmul.mubr.msk.bf16.gmra.mrb[4].mxu0 %vm555_vm11, %v546_v59  ;;  %v293_v49 = vpop.permute.xlu0 %292  ;;  %v499_v60 = vsel %vm487_vm7, %v4123_v14, %v295_v53 }
 0x12c   :  { %v497_v62 = vsel %vm487_vm7, %v4110_v4, %v293_v49  ;;  %v516_v61 = vsel %vm504_vm8, %v499_v60, %v352_v25 }
 0x12d   :  { %v514_v0 = vsel %vm504_vm8, %v497_v62, %v350_v26 }
 0x12e   :  { %v441_v63 = vpop.permute.xlu1 %440 }
 0x12f   :  { %v439_v1 = vpop.permute.xlu0 %438  ;;  %v533_v3 = vsel %vm521_vm9, %v516_v61, %v441_v63 }
 0x130   :  { %v531_v8 = vsel %vm521_vm9, %v514_v0, %v439_v1  ;;  %v550_v6 = vsel %vm538_vm10, %v533_v3, %v482_v27 }
 0x131   :  { %v548_v5 = vsel %vm538_vm10, %v531_v8, %v480_v24 }
 0x132   :  { %3776 = vmatprep.mubr.msk.bf16.mxu0 %vm555_vm11, %v548_v5  ;;  %v299_v14 = vpop.permute.xlu1 %298 }
 0x133   :  { %3777 = vmatmul.mubr.msk.bf16.gmra.mrb[8].mxu0 %vm555_vm11, %v550_v6  ;;  %v297_v4 = vpop.permute.xlu0 %296  ;;  %v503_v7 = vsel %vm487_vm7, %v4162_v30, %v299_v14 }
 0x134   :  { %v501_v9 = vsel %vm487_vm7, %v4142_v35, %v297_v4  ;;  %v520_v11 = vsel %vm504_vm8, %v503_v7, %v356_v28  ;;  %v3949_v35 = vmov 1983009808   ;;  %vm4543_vm7 = vmand %vm177_vm0, %vm1677_vm3  ;;  %vm1802_vm0 = vcmask 261120  }
 0x135   :  { %v518_v12 = vsel %vm504_vm8, %v501_v9, %v354_v50  ;;  %v754_v30 = vunpack.c.l.s4 %v3949_v35  ;;  %vm4555_vm8 = vmand %vm1687_vm4, %vm1688_vm5  ;;  %vm3106_vm4 = vcmask 1041409  }
 0x136   :  { %v445_v15 = vpop.permute.xlu1 %444 }
 0x137   :  { %v443_v10 = vpop.permute.xlu0 %442  ;;  %v537_v13 = vsel %vm521_vm9, %v520_v11, %v445_v15  ;;  %v755_v21 = vunpack.c.0.s8 %v754_v30 }
 0x138   :  { %v535_v16 = vsel %vm521_vm9, %v518_v12, %v443_v10  ;;  %vm1819_vm9 = vcmask 523264  }
 0x139   :  { %v4308_v24 = vsub.s32 %v755_v21, %v4054_v2 }
 0x13a   :  { %v486_v17 = vpop.permute.xlu1 %485 }
 0x13b   :  { %v484_v38 = vpop.permute.xlu0 %483  ;;  %v554_v18 = vsel %vm538_vm10, %v537_v13, %v486_v17 }
 0x13c   :  { %v552_v19 = vsel %vm538_vm10, %v535_v16, %v484_v38  ;;  %vm1892_vm10 = vcmask 785408  }
 0x13d   :  { %3780 = vmatprep.mubr.msk.bf16.mxu0 %vm555_vm11, %v552_v19 }
 0x13e   :  { %3781 = vmatmul.mubr.msk.bf16.gmra.mrb[12].mxu0 %vm555_vm11, %v554_v18  ;;  %vm2513_vm11 = vsmask.f32 2304 }
 0x13f   :  { %vm4881_vm3 = vmand %vm573_vm6, %vm2513_vm11  ;;  %vm3954_vm6 = vmmov 0  }
 0x1f6   :  { %v3770_v23 = vpop.f32.mrb[0].mxu0 }
 0x1f7   :  { %v684_v52 = vmul.f32 %v3770_v23, %v4298_v20  ;;  %v613_v25 = vpop.f32.mrb[1].mxu0 }
 0x1f8   :  { %v682_v26 = vmul.f32 %v4298_v20, %v613_v25  ;;  %v3771_v27 = vpop.f32.mrb[2].mxu0 }
 0x1f9   :  { %v706_v28 = vadd.f32 %v4303_v22, %v684_v52  ;;  %v685_v50 = vmul.f32 %v3771_v27, %v4298_v20  ;;  %v616_v54 = vpop.f32.mrb[3].mxu0 }
 0x1fa   :  { %v704_v33 = vadd.f32 %v4303_v22, %v682_v26  ;;  %v683_v34 = vmul.f32 %v4298_v20, %v616_v54 }
 0x1fb   :  { %v722_v36 = vmax.f32 %v706_v28, 0.0  ;;  %v707_v37 = vadd.f32 %v4303_v22, %v685_v50 }
 0x1fc   :  { %v720_v39 = vmax.f32 %v704_v33, 0.0  ;;  %v705_v40 = vadd.f32 %v4303_v22, %v683_v34 }
 0x1fd   :  { %v786_v41 = vcombine.high %v722_v36, %v722_v36  ;;  %v793_v42 = vrot.slane %v722_v36, %v4308_v24  ;;  %v723_v2 = vmax.f32 %v707_v37, 0.0 }
 0x1fe   :  { %v752_v43 = vcombine.high %v720_v39, %v720_v39  ;;  %v759_v44 = vrot.slane %v720_v39, %v4308_v24  ;;  %v4318_v29 = vmax.f32 %v705_v40, 0.0  ;;  %v4320_v31 = vpop.f32.mrb[4].mxu0 }
 0x1ff   :  { %v800_v45 = vrot.slane %v786_v41, %v4308_v24  ;;  %v801_v46 = vcombine.high %v793_v42, %v793_v42  ;;  %v3540_v47 = vrot.slane %v793_v42, 9  ;;  %v803_v48 = vcombine.high %v723_v2, %v723_v2  ;;  %v4323_v51 = vpop.f32.mrb[5].mxu0 }
 0x200   :  { %v766_v32 = vrot.slane %v752_v43, %v4308_v24  ;;  %v767_v55 = vcombine.high %v759_v44, %v759_v44  ;;  %v3532_v56 = vrot.slane %v759_v44, 9  ;;  %v810_v57 = vrot.slane %v723_v2, %v4308_v24  ;;  %v4327_v58 = vpop.f32.mrb[6].mxu0 }
 0x201   :  { %v802_v59 = vcombine.high %v800_v45, %v800_v45  ;;  %v3541_v53 = vrot.slane %v801_v46, 9  ;;  %v3542_v49 = vrot.slane %v800_v45, 9  ;;  %v1288_v60 = vmax.f32 %v793_v42, %v3540_v47  ;;  %v4329_v62 = vpop.f32.mrb[7].mxu0 }
 0x202   :  { %v768_v61 = vcombine.high %v766_v32, %v766_v32  ;;  %v3533_v63 = vrot.slane %v767_v55, 9  ;;  %v3534_v0 = vrot.slane %v766_v32, 9  ;;  %v1280_v1 = vmax.f32 %v759_v44, %v3532_v56 }
 0x203   :  { %v3543_v3 = vrot.slane %v802_v59, 9  ;;  %v1289_v8 = vmax.f32 %v801_v46, %v3541_v53  ;;  %v1290_v5 = vmax.f32 %v800_v45, %v3542_v49  ;;  %v1366_v6 = vpack.c.bf16 %v1288_v60, %v1288_v60 }
 0x204   :  { %v3535_v14 = vrot.slane %v768_v61, 9  ;;  %v1281_v4 = vmax.f32 %v767_v55, %v3533_v63  ;;  %v1282_v7 = vmax.f32 %v766_v32, %v3534_v0  ;;  %v1358_v9 = vpack.c.bf16 %v1280_v1, %v1280_v1 }
 0x205   :  { %v1291_v15 = vmax.f32 %v802_v59, %v3543_v3  ;;  %v1367_v10 = vpack.c.bf16 %v1289_v8, %v1289_v8  ;;  %v1368_v11 = vpack.c.bf16 %v1290_v5, %v1290_v5  ;;  %v1494_v12 = vunpack.c.l.b16 %v1366_v6 }
 0x206   :  { %v1283_v13 = vmax.f32 %v768_v61, %v3535_v14  ;;  %v1359_v16 = vpack.c.bf16 %v1281_v4, %v1281_v4  ;;  %v1360_v17 = vpack.c.bf16 %v1282_v7, %v1282_v7  ;;  %v1486_v38 = vunpack.c.l.b16 %v1358_v9  ;;  %v4331_v18 = vpop.f32.mrb[8].mxu0 }
 0x207   :  { %v1369_v19 = vpack.c.bf16 %v1291_v15, %v1291_v15  ;;  %v1495_v35 = vunpack.c.l.b16 %v1367_v10  ;;  %v1496_v30 = vunpack.c.l.b16 %v1368_v11  ;;  %v1569_v21 = vrot.slane %v1494_v12, 7  ;;  %v4333_v23 = vpop.f32.mrb[9].mxu0 }
 0x208   :  { %v1361_v52 = vpack.c.bf16 %v1283_v13, %v1283_v13  ;;  %v1487_v25 = vunpack.c.l.b16 %v1359_v16  ;;  %v1488_v26 = vunpack.c.l.b16 %v1360_v17  ;;  %v1550_v27 = vrot.slane %v1486_v38, 7  ;;  %v4335_v28 = vpop.f32.mrb[10].mxu0 }
 0x209   :  { %v1497_v50 = vunpack.c.l.b16 %v1369_v19  ;;  %v1570_v54 = vrot.slane %v1495_v35, 6  ;;  %v1572_v33 = vrot.slane %v1496_v30, 5  ;;  %v817_v34 = vrot.slane %v803_v48, %v4308_v24  ;;  %v4338_v36 = vpop.f32.mrb[11].mxu0 }
 0x20a   :  { %v1489_v37 = vunpack.c.l.b16 %v1361_v52  ;;  %v1551_v39 = vrot.slane %v1487_v25, 6  ;;  %v1554_v40 = vrot.slane %v1488_v26, 5  ;;  %v818_v41 = vcombine.high %v810_v57, %v810_v57 }
 0x20b   :  { %v1571_v42 = vsel %vm1552_vm12, %v1570_v54, %v1569_v21  ;;  %v1574_v2 = vrot.slane %v1497_v50, 4  ;;  %v819_v43 = vcombine.high %v817_v34, %v817_v34  ;;  %v3544_v44 = vrot.slane %v810_v57, 9 }
 0x20c   :  { %v1573_v45 = vsel %vm1555_vm13, %v1572_v33, %v1571_v42  ;;  %v1553_v46 = vsel %vm1552_vm12, %v1551_v39, %v1550_v27  ;;  %v3545_v47 = vrot.slane %v818_v41, 9  ;;  %v1557_v32 = vrot.slane %v1489_v37, 4 }
 0x20d   :  { %v3546_v55 = vrot.slane %v817_v34, 9  ;;  %v3547_v48 = vrot.slane %v819_v43, 9  ;;  %v1292_v56 = vmax.f32 %v810_v57, %v3544_v44  ;;  %v1556_v59 = vsel %vm1555_vm13, %v1554_v40, %v1553_v46 }
 0x20e   :  { %v1293_v53 = vmax.f32 %v818_v41, %v3545_v47  ;;  %v769_v49 = vcombine.high %v4318_v29, %v4318_v29  ;;  %v776_v60 = vrot.slane %v4318_v29, %v4308_v24  ;;  %v1575_v1 = vsel %vm1558_vm14, %v1574_v2, %v1573_v45 }
 0x20f   :  { %v1294_v61 = vmax.f32 %v817_v34, %v3546_v55  ;;  %v4348_v63 = vmax.f32 %v819_v43, %v3547_v48  ;;  %v1370_v0 = vpack.c.bf16 %v1292_v56, %v1292_v56  ;;  %v688_v4 = vmul.f32 %v4320_v31, %v4298_v20  ;;  %v3880_v31 = vld [vmem:[%s5203_s4] sm:$0xff]  }
 0x210   :  { %v1371_v3 = vpack.c.bf16 %v1293_v53, %v1293_v53  ;;  %v783_v8 = vrot.slane %v769_v49, %v4308_v24  ;;  %v784_v5 = vcombine.high %v776_v60, %v776_v60  ;;  %v3536_v57 = vrot.slane %v776_v60, 9  ;;  %3784 = vmatprep.subr.bf16.mxu1 %v3880_v31 }
 0x211   :  { %v1372_v6 = vpack.c.bf16 %v1294_v61, %v1294_v61  ;;  %v1498_v14 = vunpack.c.l.b16 %v1370_v0  ;;  %v686_v7 = vmul.f32 %v4298_v20, %v4323_v51  ;;  %v4356_v29 = vpop.f32.mrb[12].mxu0  ;;  %v710_v38 = vadd.f32 %v4303_v22, %v688_v4  ;;  %v3881_v51 = vld [vmem:[%s5203_s4 + $0x8] sm:$0xff]   ;;  %3785 = vmatpush3.bf16.msra.mxu1 %v3880_v31 }
 0x212   :  { %v4358_v9 = vunpack.c.l.b16 %v1371_v3  ;;  %v785_v15 = vcombine.high %v783_v8, %v783_v8  ;;  %v3537_v10 = vrot.slane %v784_v5, 9  ;;  %v3538_v11 = vrot.slane %v783_v8, 9  ;;  %v4360_v12 = vpop.f32.mrb[13].mxu0  ;;  %3786 = vmatprep.subr.bf16.mxu1 %v3881_v51 }
 0x213   :  { %v4362_v13 = vunpack.c.l.b16 %v1372_v6  ;;  %v1576_v16 = vrot.slane %v1498_v14, 3  ;;  %v1284_v17 = vmax.f32 %v776_v60, %v3536_v57  ;;  %v4365_v19 = vpop.f32.mrb[14].mxu0  ;;  %v1559_v52 = vsel %vm1558_vm14, %v1557_v32, %v1556_v59 }
 0x214   :  { %v3539_v35 = vrot.slane %v785_v15, 9  ;;  %v1285_v30 = vmax.f32 %v784_v5, %v3537_v10  ;;  %v1286_v21 = vmax.f32 %v783_v8, %v3538_v11  ;;  %v4374_v25 = vpop.f32.mrb[15].mxu0  ;;  %v1578_v27 = vrot.slane %v4358_v9, 2  ;;  %v3883_v9 = vld [vmem:[%s5203_s4 + $0x18] sm:$0xff]  }
 0x215   :  { %v4377_v26 = vsel %vm1561_vm15, %v1576_v16, %v1575_v1  ;;  %v1362_v50 = vpack.c.bf16 %v1284_v17, %v1284_v17  ;;  %v726_v54 = vmax.f32 %v710_v38, 0.0  ;;  %v1580_v33 = vrot.slane %v4362_v13, 1  ;;  %3787 = vmatpush3.bf16.msra.mxu1 %v3881_v51 }
 0x216   :  { %v1363_v34 = vpack.c.bf16 %v1285_v30, %v1285_v30  ;;  %v1364_v37 = vpack.c.bf16 %v1286_v21, %v1286_v21  ;;  %v708_v39 = vadd.f32 %v4303_v22, %v686_v7  ;;  %v4382_v40 = vmax.f32 %v785_v15, %v3539_v35 }
 0x217   :  { %v1490_v41 = vunpack.c.l.b16 %v1362_v50  ;;  %v854_v42 = vcombine.high %v726_v54, %v726_v54  ;;  %v861_v2 = vrot.slane %v726_v54, %v4308_v24  ;;  %v689_v46 = vmul.f32 %v4327_v58, %v4298_v20 }
 0x218   :  { %v4385_v43 = vunpack.c.l.b16 %v1363_v34  ;;  %v4387_v44 = vunpack.c.l.b16 %v1364_v37  ;;  %v724_v45 = vmax.f32 %v708_v39, 0.0  ;;  %v687_v49 = vmul.f32 %v4298_v20, %v4329_v62 }
 0x219   :  { %v1560_v47 = vrot.slane %v1490_v41, 3  ;;  %v868_v32 = vrot.slane %v854_v42, %v4308_v24  ;;  %v869_v55 = vcombine.high %v861_v2, %v861_v2  ;;  %v3556_v48 = vrot.slane %v861_v2, 9 }
 0x21a   :  { %v1563_v56 = vrot.slane %v4385_v43, 2  ;;  %v820_v59 = vcombine.high %v724_v45, %v724_v45  ;;  %v827_v53 = vrot.slane %v724_v45, %v4308_v24  ;;  %v711_v4 = vadd.f32 %v4303_v22, %v689_v46 }
 0x21b   :  { %v4397_v60 = vsel %vm1561_vm15, %v1560_v47, %v1559_v52  ;;  %v870_v61 = vcombine.high %v868_v32, %v868_v32  ;;  %v3557_v0 = vrot.slane %v869_v55, 9  ;;  %v3558_v58 = vrot.slane %v868_v32, 9 }
 0x21c   :  { %v1304_v1 = vmax.f32 %v861_v2, %v3556_v48  ;;  %v834_v3 = vrot.slane %v820_v59, %v4308_v24  ;;  %v835_v8 = vcombine.high %v827_v53, %v827_v53  ;;  %v3548_v5 = vrot.slane %v827_v53, 9 }
 0x21d   :  { %v3559_v57 = vrot.slane %v870_v61, 9  ;;  %v1305_v6 = vmax.f32 %v869_v55, %v3557_v0  ;;  %v1306_v14 = vmax.f32 %v868_v32, %v3558_v58  ;;  %v727_v48 = vmax.f32 %v711_v4, 0.0 }
 0x21e   :  { %v1382_v7 = vpack.c.bf16 %v1304_v1, %v1304_v1  ;;  %v836_v15 = vcombine.high %v834_v3, %v834_v3  ;;  %v3549_v62 = vrot.slane %v835_v8, 9  ;;  %v3550_v10 = vrot.slane %v834_v3, 9 }
 0x21f   :  { %v1307_v11 = vmax.f32 %v870_v61, %v3559_v57  ;;  %v1383_v16 = vpack.c.bf16 %v1305_v6, %v1305_v6  ;;  %v1384_v17 = vpack.c.bf16 %v1306_v14, %v1306_v14  ;;  %v1296_v38 = vmax.f32 %v827_v53, %v3548_v5 }
 0x220   :  { %v1510_v31 = vunpack.c.l.b16 %v1382_v7  ;;  %v3551_v51 = vrot.slane %v836_v15, 9  ;;  %v1297_v35 = vmax.f32 %v835_v8, %v3549_v62  ;;  %v1298_v30 = vmax.f32 %v834_v3, %v3550_v10 }
 0x221   :  { %v1385_v21 = vpack.c.bf16 %v1307_v11, %v1307_v11  ;;  %v1511_v52 = vunpack.c.l.b16 %v1383_v16  ;;  %v1512_v50 = vunpack.c.l.b16 %v1384_v17  ;;  %v1374_v54 = vpack.c.bf16 %v1296_v38, %v1296_v38 }
 0x222   :  { %v1595_v34 = vrot.slane %v1510_v31, 7  ;;  %v1299_v37 = vmax.f32 %v836_v15, %v3551_v51  ;;  %v1375_v39 = vpack.c.bf16 %v1297_v35, %v1297_v35  ;;  %v1376_v41 = vpack.c.bf16 %v1298_v30, %v1298_v30 }
 0x223   :  { %v1513_v42 = vunpack.c.l.b16 %v1385_v21  ;;  %v1596_v2 = vrot.slane %v1511_v52, 6  ;;  %v1598_v45 = vrot.slane %v1512_v50, 5  ;;  %v1502_v46 = vunpack.c.l.b16 %v1374_v54 }
 0x224   :  { %v1377_v47 = vpack.c.bf16 %v1299_v37, %v1299_v37  ;;  %v1503_v32 = vunpack.c.l.b16 %v1375_v39  ;;  %v1504_v55 = vunpack.c.l.b16 %v1376_v41  ;;  %v709_v0 = vadd.f32 %v4303_v22, %v687_v49 }
 0x225   :  { %v1597_v59 = vsel %vm1552_vm12, %v1596_v2, %v1595_v34  ;;  %v1600_v53 = vrot.slane %v1513_v42, 4  ;;  %v1582_v61 = vrot.slane %v1502_v46, 7  ;;  %v1566_v5 = vrot.slane %v4387_v44, 1 }
 0x226   :  { %v1599_v58 = vsel %vm1555_vm13, %v1598_v45, %v1597_v59  ;;  %v1505_v1 = vunpack.c.l.b16 %v1377_v47  ;;  %v1583_v3 = vrot.slane %v1503_v32, 6  ;;  %v1585_v8 = vrot.slane %v1504_v55, 5 }
 0x227   :  { %v871_v57 = vcombine.high %v727_v48, %v727_v48  ;;  %v878_v6 = vrot.slane %v727_v48, %v4308_v24  ;;  %v725_v14 = vmax.f32 %v709_v0, 0.0  ;;  %v1601_v15 = vsel %vm1558_vm14, %v1600_v53, %v1599_v58 }
 0x228   :  { %v1584_v7 = vsel %vm1552_vm12, %v1583_v3, %v1582_v61  ;;  %v1587_v4 = vrot.slane %v1505_v1, 4  ;;  %v692_v62 = vmul.f32 %v4331_v18, %v4298_v20  ;;  %v690_v16 = vmul.f32 %v4298_v20, %v4333_v23 }
 0x229   :  { %v885_v49 = vrot.slane %v871_v57, %v4308_v24  ;;  %v886_v10 = vcombine.high %v878_v6, %v878_v6  ;;  %v3560_v11 = vrot.slane %v878_v6, 9  ;;  %v1586_v17 = vsel %vm1555_vm13, %v1585_v8, %v1584_v7 }
 0x22a   :  { %v837_v38 = vcombine.high %v725_v14, %v725_v14  ;;  %v844_v31 = vrot.slane %v725_v14, %v4308_v24  ;;  %v714_v51 = vadd.f32 %v4303_v22, %v692_v62  ;;  %v1588_v48 = vsel %vm1558_vm14, %v1587_v4, %v1586_v17 }
 0x22b   :  { %v887_v35 = vcombine.high %v885_v49, %v885_v49  ;;  %v3561_v30 = vrot.slane %v886_v10, 9  ;;  %v3562_v21 = vrot.slane %v885_v49, 9  ;;  %v1308_v52 = vmax.f32 %v878_v6, %v3560_v11 }
 0x22c   :  { %v851_v18 = vrot.slane %v837_v38, %v4308_v24  ;;  %v852_v50 = vcombine.high %v844_v31, %v844_v31  ;;  %v3552_v54 = vrot.slane %v844_v31, 9  ;;  %v730_v34 = vmax.f32 %v714_v51, 0.0 }
 0x22d   :  { %v3563_v37 = vrot.slane %v887_v35, 9  ;;  %v1309_v39 = vmax.f32 %v886_v10, %v3561_v30  ;;  %v1310_v41 = vmax.f32 %v885_v49, %v3562_v21  ;;  %v1386_v23 = vpack.c.bf16 %v1308_v52, %v1308_v52 }
 0x22e   :  { %v853_v42 = vcombine.high %v851_v18, %v851_v18  ;;  %v3553_v2 = vrot.slane %v852_v50, 9  ;;  %v3554_v45 = vrot.slane %v851_v18, 9  ;;  %v1300_v46 = vmax.f32 %v844_v31, %v3552_v54 }
 0x22f   :  { %v1387_v47 = vpack.c.bf16 %v1309_v39, %v1309_v39  ;;  %v1388_v32 = vpack.c.bf16 %v1310_v41, %v1310_v41  ;;  %v1514_v55 = vunpack.c.l.b16 %v1386_v23  ;;  %v4418_v58 = vmax.f32 %v887_v35, %v3563_v37 }
 0x230   :  { %v3555_v59 = vrot.slane %v853_v42, 9  ;;  %v1301_v53 = vmax.f32 %v852_v50, %v3553_v2  ;;  %v1302_v61 = vmax.f32 %v851_v18, %v3554_v45  ;;  %v1378_v0 = vpack.c.bf16 %v1300_v46, %v1300_v46 }
 0x231   :  { %v4420_v1 = vunpack.c.l.b16 %v1387_v47  ;;  %v1602_v3 = vrot.slane %v1514_v55, 3  ;;  %v922_v8 = vcombine.high %v730_v34, %v730_v34  ;;  %v4422_v57 = vunpack.c.l.b16 %v1388_v32 }
 0x232   :  { %v1379_v6 = vpack.c.bf16 %v1301_v53, %v1301_v53  ;;  %v1380_v14 = vpack.c.bf16 %v1302_v61, %v1302_v61  ;;  %v1506_v7 = vunpack.c.l.b16 %v1378_v0  ;;  %v4428_v49 = vmax.f32 %v853_v42, %v3555_v59 }
 0x233   :  { %v4425_v62 = vsel %vm1561_vm15, %v1602_v3, %v1601_v15  ;;  %v1604_v4 = vrot.slane %v4420_v1, 2  ;;  %v929_v10 = vrot.slane %v730_v34, %v4308_v24  ;;  %v936_v31 = vrot.slane %v922_v8, %v4308_v24 }
 0x234   :  { %v4431_v11 = vunpack.c.l.b16 %v1379_v6  ;;  %v4433_v17 = vunpack.c.l.b16 %v1380_v14  ;;  %v1589_v38 = vrot.slane %v1506_v7, 3  ;;  %v712_v30 = vadd.f32 %v4303_v22, %v690_v16 }
 0x235   :  { %v937_v51 = vcombine.high %v929_v10, %v929_v10  ;;  %v3572_v35 = vrot.slane %v929_v10, 9  ;;  %v693_v15 = vmul.f32 %v4335_v28, %v4298_v20  ;;  %v1606_v21 = vrot.slane %v4422_v57, 1 }
 0x236   :  { %v4441_v52 = vsel %vm1561_vm15, %v1589_v38, %v1588_v48  ;;  %v938_v50 = vcombine.high %v936_v31, %v936_v31  ;;  %v3574_v34 = vrot.slane %v936_v31, 9  ;;  %v728_v39 = vmax.f32 %v712_v30, 0.0 }
 0x237   :  { %v3573_v54 = vrot.slane %v937_v51, 9  ;;  %v1320_v37 = vmax.f32 %v929_v10, %v3572_v35  ;;  %v715_v16 = vadd.f32 %v4303_v22, %v693_v15  ;;  %v691_v28 = vmul.f32 %v4298_v20, %v4338_v36 }
 0x238   :  { %v3575_v23 = vrot.slane %v938_v50, 9  ;;  %v1322_v2 = vmax.f32 %v936_v31, %v3574_v34  ;;  %v888_v46 = vcombine.high %v728_v39, %v728_v39  ;;  %v895_v32 = vrot.slane %v728_v39, %v4308_v24 }
 0x239   :  { %v1321_v42 = vmax.f32 %v937_v51, %v3573_v54  ;;  %v1398_v45 = vpack.c.bf16 %v1320_v37, %v1320_v37  ;;  %v731_v55 = vmax.f32 %v715_v16, 0.0  ;;  %v696_v48 = vmul.f32 %v4356_v29, %v4298_v20 }
 0x23a   :  { %v1323_v47 = vmax.f32 %v938_v50, %v3575_v23  ;;  %v1400_v53 = vpack.c.bf16 %v1322_v2, %v1322_v2  ;;  %v902_v0 = vrot.slane %v888_v46, %v4308_v24  ;;  %v903_v8 = vcombine.high %v895_v32, %v895_v32 }
 0x23b   :  { %v1399_v59 = vpack.c.bf16 %v1321_v42, %v1321_v42  ;;  %v1526_v61 = vunpack.c.l.b16 %v1398_v45  ;;  %v3564_v6 = vrot.slane %v895_v32, 9  ;;  %v713_v36 = vadd.f32 %v4303_v22, %v691_v28 }
 0x23c   :  { %v1401_v3 = vpack.c.bf16 %v1323_v47, %v1323_v47  ;;  %v1528_v7 = vunpack.c.l.b16 %v1400_v53  ;;  %v904_v10 = vcombine.high %v902_v0, %v902_v0  ;;  %v939_v38 = vcombine.high %v731_v55, %v731_v55 }
 0x23d   :  { %v1527_v14 = vunpack.c.l.b16 %v1399_v59  ;;  %v3565_v51 = vrot.slane %v903_v8, 9  ;;  %v3566_v35 = vrot.slane %v902_v0, 9  ;;  %v1312_v30 = vmax.f32 %v895_v32, %v3564_v6 }
 0x23e   :  { %v1529_v31 = vunpack.c.l.b16 %v1401_v3  ;;  %v1621_v15 = vrot.slane %v1526_v61, 7  ;;  %v3567_v50 = vrot.slane %v904_v10, 9  ;;  %v946_v54 = vrot.slane %v731_v55, %v4308_v24 }
 0x23f   :  { %v1622_v29 = vrot.slane %v1527_v14, 6  ;;  %v1624_v34 = vrot.slane %v1528_v7, 5  ;;  %v1313_v37 = vmax.f32 %v903_v8, %v3565_v51  ;;  %v1314_v39 = vmax.f32 %v902_v0, %v3566_v35 }
 0x240   :  { %v1390_v23 = vpack.c.bf16 %v1312_v30, %v1312_v30  ;;  %v1315_v28 = vmax.f32 %v904_v10, %v3567_v50  ;;  %v953_v42 = vrot.slane %v939_v38, %v4308_v24  ;;  %v954_v2 = vcombine.high %v946_v54, %v946_v54 }
 0x241   :  { %v1623_v16 = vsel %vm1552_vm12, %v1622_v29, %v1621_v15  ;;  %v1626_v45 = vrot.slane %v1529_v31, 4  ;;  %v1391_v46 = vpack.c.bf16 %v1313_v37, %v1313_v37  ;;  %v1392_v47 = vpack.c.bf16 %v1314_v39, %v1314_v39 }
 0x242   :  { %v1518_v59 = vunpack.c.l.b16 %v1390_v23  ;;  %v1393_v32 = vpack.c.bf16 %v1315_v28, %v1315_v28  ;;  %v955_v53 = vcombine.high %v953_v42, %v953_v42  ;;  %v3576_v61 = vrot.slane %v946_v54, 9 }
 0x243   :  { %v3577_v3 = vrot.slane %v954_v2, 9  ;;  %v1625_v55 = vsel %vm1555_vm13, %v1624_v34, %v1623_v16  ;;  %v1519_v6 = vunpack.c.l.b16 %v1391_v46  ;;  %v1520_v8 = vunpack.c.l.b16 %v1392_v47 }
 0x244   :  { %v3578_v0 = vrot.slane %v953_v42, 9  ;;  %v1521_v14 = vunpack.c.l.b16 %v1393_v32  ;;  %v1608_v7 = vrot.slane %v1518_v59, 7  ;;  %v1324_v51 = vmax.f32 %v946_v54, %v3576_v61 }
 0x245   :  { %v1325_v10 = vmax.f32 %v954_v2, %v3577_v3  ;;  %v1609_v35 = vrot.slane %v1519_v6, 6  ;;  %v1611_v38 = vrot.slane %v1520_v8, 5  ;;  %v3579_v30 = vrot.slane %v955_v53, 9 }
 0x246   :  { %v1326_v31 = vmax.f32 %v953_v42, %v3578_v0  ;;  %v1613_v15 = vrot.slane %v1521_v14, 4  ;;  %v1402_v29 = vpack.c.bf16 %v1324_v51, %v1324_v51  ;;  %v1627_v37 = vsel %vm1558_vm14, %v1626_v45, %v1625_v55 }
 0x247   :  { %v1403_v50 = vpack.c.bf16 %v1325_v10, %v1325_v10  ;;  %v1610_v39 = vsel %vm1552_vm12, %v1609_v35, %v1608_v7  ;;  %v729_v34 = vmax.f32 %v713_v36, 0.0  ;;  %v718_v16 = vadd.f32 %v4303_v22, %v696_v48 }
 0x248   :  { %v1404_v23 = vpack.c.bf16 %v1326_v31, %v1326_v31  ;;  %v1612_v28 = vsel %vm1555_vm13, %v1611_v38, %v1610_v39  ;;  %v1530_v46 = vunpack.c.l.b16 %v1402_v29  ;;  %v694_v2 = vmul.f32 %v4298_v20, %v4360_v12 }
 0x249   :  { %v4461_v54 = vunpack.c.l.b16 %v1403_v50  ;;  %v4465_v42 = vmax.f32 %v955_v53, %v3579_v30  ;;  %v905_v59 = vcombine.high %v729_v34, %v729_v34  ;;  %v912_v45 = vrot.slane %v729_v34, %v4308_v24 }
 0x24a   :  { %v4467_v47 = vunpack.c.l.b16 %v1404_v23  ;;  %v1628_v32 = vrot.slane %v1530_v46, 3  ;;  %v1614_v36 = vsel %vm1558_vm14, %v1613_v15, %v1612_v28  ;;  %v734_v61 = vmax.f32 %v718_v16, 0.0 }
 0x24b   :  { %v716_v48 = vadd.f32 %v4303_v22, %v694_v2  ;;  %v919_v55 = vrot.slane %v905_v59, %v4308_v24  ;;  %v920_v6 = vcombine.high %v912_v45, %v912_v45  ;;  %v3568_v8 = vrot.slane %v912_v45, 9 }
 0x24c   :  { %v4475_v12 = vsel %vm1561_vm15, %v1628_v32, %v1627_v37  ;;  %v990_v53 = vcombine.high %v734_v61, %v734_v61  ;;  %v997_v0 = vrot.slane %v734_v61, %v4308_v24  ;;  %v5229_v57 = vrot.slane %v4433_v17, 1 }
 0x24d   :  { %v732_v14 = vmax.f32 %v716_v48, 0.0  ;;  %v921_v7 = vcombine.high %v919_v55, %v919_v55  ;;  %v3569_v51 = vrot.slane %v920_v6, 9  ;;  %v3570_v10 = vrot.slane %v919_v55, 9 }
 0x24e   :  { %v1316_v35 = vmax.f32 %v912_v45, %v3568_v8  ;;  %v1004_v30 = vrot.slane %v990_v53, %v4308_v24  ;;  %v1005_v31 = vcombine.high %v997_v0, %v997_v0  ;;  %v3588_v15 = vrot.slane %v997_v0, 9 }
 0x24f   :  { %v3571_v29 = vrot.slane %v921_v7, 9  ;;  %v1317_v50 = vmax.f32 %v920_v6, %v3569_v51  ;;  %v1318_v39 = vmax.f32 %v919_v55, %v3570_v10  ;;  %v956_v32 = vcombine.high %v732_v14, %v732_v14 }
 0x250   :  { %v1394_v23 = vpack.c.bf16 %v1316_v35, %v1316_v35  ;;  %v1006_v37 = vcombine.high %v1004_v30, %v1004_v30  ;;  %v3589_v34 = vrot.slane %v1005_v31, 9  ;;  %v3590_v16 = vrot.slane %v1004_v30, 9 }
 0x251   :  { %v1336_v28 = vmax.f32 %v997_v0, %v3588_v15  ;;  %v1395_v46 = vpack.c.bf16 %v1317_v50, %v1317_v50  ;;  %v1396_v2 = vpack.c.bf16 %v1318_v39, %v1318_v39  ;;  %v4480_v38 = vmax.f32 %v921_v7, %v3571_v29 }
 0x252   :  { %v1522_v59 = vunpack.c.l.b16 %v1394_v23  ;;  %v3591_v61 = vrot.slane %v1006_v37, 9  ;;  %v1337_v45 = vmax.f32 %v1005_v31, %v3589_v34  ;;  %v1338_v48 = vmax.f32 %v1004_v30, %v3590_v16 }
 0x253   :  { %v1414_v8 = vpack.c.bf16 %v1336_v28, %v1336_v28  ;;  %v4482_v53 = vunpack.c.l.b16 %v1395_v46  ;;  %v963_v55 = vrot.slane %v732_v14, %v4308_v24  ;;  %v4485_v0 = vunpack.c.l.b16 %v1396_v2 }
 0x254   :  { %v1615_v3 = vrot.slane %v1522_v59, 3  ;;  %v1339_v6 = vmax.f32 %v1006_v37, %v3591_v61  ;;  %v1415_v51 = vpack.c.bf16 %v1337_v45, %v1337_v45  ;;  %v1416_v10 = vpack.c.bf16 %v1338_v48, %v1338_v48 }
 0x255   :  { %v1542_v35 = vunpack.c.l.b16 %v1414_v8  ;;  %v970_v30 = vrot.slane %v956_v32, %v4308_v24  ;;  %v971_v23 = vcombine.high %v963_v55, %v963_v55  ;;  %v3580_v14 = vrot.slane %v963_v55, 9 }
 0x256   :  { %v4488_v15 = vsel %vm1561_vm15, %v1615_v3, %v1614_v36  ;;  %v1417_v7 = vpack.c.bf16 %v1339_v6, %v1339_v6  ;;  %v1543_v29 = vunpack.c.l.b16 %v1415_v51  ;;  %v1544_v50 = vunpack.c.l.b16 %v1416_v10 }
 0x257   :  { %v1647_v39 = vrot.slane %v1542_v35, 7  ;;  %v972_v34 = vcombine.high %v970_v30, %v970_v30  ;;  %v3582_v37 = vrot.slane %v970_v30, 9  ;;  %v697_v2 = vmul.f32 %v4365_v19, %v4298_v20 }
 0x258   :  { %v1545_v16 = vunpack.c.l.b16 %v1417_v7  ;;  %v1648_v28 = vrot.slane %v1543_v29, 6  ;;  %v1650_v46 = vrot.slane %v1544_v50, 5  ;;  %v3581_v36 = vrot.slane %v971_v23, 9 }
 0x259   :  { %v3583_v3 = vrot.slane %v972_v34, 9  ;;  %v1328_v59 = vmax.f32 %v963_v55, %v3580_v14  ;;  %v1330_v61 = vmax.f32 %v970_v30, %v3582_v37  ;;  %v719_v48 = vadd.f32 %v4303_v22, %v697_v2 }
 0x25a   :  { %v1649_v32 = vsel %vm1552_vm12, %v1648_v28, %v1647_v39  ;;  %v1652_v45 = vrot.slane %v1545_v16, 4  ;;  %v695_v8 = vmul.f32 %v4298_v20, %v4374_v25  ;;  %v1329_v51 = vmax.f32 %v971_v23, %v3581_v36 }
 0x25b   :  { %v1651_v6 = vsel %vm1555_vm13, %v1650_v46, %v1649_v32  ;;  %v1331_v10 = vmax.f32 %v972_v34, %v3583_v3  ;;  %v1406_v35 = vpack.c.bf16 %v1328_v59, %v1328_v59  ;;  %v1408_v19 = vpack.c.bf16 %v1330_v61, %v1330_v61 }
 0x25c   :  { %v735_v29 = vmax.f32 %v719_v48, 0.0  ;;  %v717_v55 = vadd.f32 %v4303_v22, %v695_v8  ;;  %v1407_v30 = vpack.c.bf16 %v1329_v51, %v1329_v51  ;;  %v1653_v14 = vsel %vm1558_vm14, %v1652_v45, %v1651_v6 }
 0x25d   :  { %v1409_v50 = vpack.c.bf16 %v1331_v10, %v1331_v10  ;;  %v1534_v39 = vunpack.c.l.b16 %v1406_v35  ;;  %v1536_v37 = vunpack.c.l.b16 %v1408_v19  ;;  %v1373_v46 = vpack.c.bf16 %v4348_v63, %v4348_v63 }
 0x25e   :  { %v1007_v16 = vcombine.high %v735_v29, %v735_v29  ;;  %v1014_v20 = vrot.slane %v735_v29, %v4308_v24  ;;  %v733_v25 = vmax.f32 %v717_v55, 0.0  ;;  %v1535_v28 = vunpack.c.l.b16 %v1407_v30 }
 0x25f   :  { %v1537_v23 = vunpack.c.l.b16 %v1409_v50  ;;  %v1634_v34 = vrot.slane %v1534_v39, 7  ;;  %v1637_v2 = vrot.slane %v1536_v37, 5  ;;  %v1405_v17 = vpack.c.bf16 %v4465_v42, %v4465_v42 }
 0x260   :  { %v1021_v36 = vrot.slane %v1007_v16, %v4308_v24  ;;  %v1022_v22 = vcombine.high %v1014_v20, %v1014_v20  ;;  %v3592_v3 = vrot.slane %v1014_v20, 9  ;;  %v1635_v59 = vrot.slane %v1535_v28, 6 }
 0x261   :  { %v1639_v61 = vrot.slane %v1537_v23, 4  ;;  %v973_v32 = vcombine.high %v733_v25, %v733_v25  ;;  %v980_v45 = vrot.slane %v733_v25, %v4308_v24  ;;  %v5230_v42 = vrot.slane %v4461_v54, 2 }
 0x262   :  { %v1023_v48 = vcombine.high %v1021_v36, %v1021_v36  ;;  %v3593_v8 = vrot.slane %v1022_v22, 9  ;;  %v3594_v6 = vrot.slane %v1021_v36, 9  ;;  %v1340_v51 = vmax.f32 %v1014_v20, %v3592_v3 }
 0x263   :  { %v1636_v10 = vsel %vm1552_vm12, %v1635_v59, %v1634_v34  ;;  %v987_v63 = vrot.slane %v973_v32, %v4308_v24  ;;  %v988_v35 = vcombine.high %v980_v45, %v980_v45  ;;  %v3584_v19 = vrot.slane %v980_v45, 9 }
 0x264   :  { %v1638_v29 = vsel %vm1555_vm13, %v1637_v2, %v1636_v10  ;;  %v3595_v55 = vrot.slane %v1023_v48, 9  ;;  %v1341_v30 = vmax.f32 %v1022_v22, %v3593_v8  ;;  %v1342_v50 = vmax.f32 %v1021_v36, %v3594_v6  ;;  %v3882_v36 = vld [vmem:[%s5203_s4 + $0x10] sm:$0xff]  }
 0x265   :  { %v1418_v39 = vpack.c.bf16 %v1340_v51, %v1340_v51  ;;  %v989_v37 = vcombine.high %v987_v63, %v987_v63  ;;  %v3585_v16 = vrot.slane %v988_v35, 9  ;;  %v3586_v25 = vrot.slane %v987_v63, 9  ;;  %3788 = vmatprep.subr.bf16.mxu1 %v3882_v36 }
 0x266   :  { %v1343_v20 = vmax.f32 %v1023_v48, %v3595_v55  ;;  %v1419_v28 = vpack.c.bf16 %v1341_v30, %v1341_v30  ;;  %v1420_v23 = vpack.c.bf16 %v1342_v50, %v1342_v50  ;;  %v1332_v3 = vmax.f32 %v980_v45, %v3584_v19  ;;  %3789 = vmatpush3.bf16.msra.mxu1 %v3882_v36 }
 0x267   :  { %v1546_v34 = vunpack.c.l.b16 %v1418_v39  ;;  %v3587_v59 = vrot.slane %v989_v37, 9  ;;  %v1333_v32 = vmax.f32 %v988_v35, %v3585_v16  ;;  %v1334_v7 = vmax.f32 %v987_v63, %v3586_v25  ;;  %3790 = vmatprep.subr.bf16.mxu1 %v3883_v9 }
 0x268   :  { %v1421_v31 = vpack.c.bf16 %v1343_v20, %v1343_v20  ;;  %v4510_v41 = vunpack.c.l.b16 %v1419_v28  ;;  %v4512_v18 = vunpack.c.l.b16 %v1420_v23  ;;  %v1410_v2 = vpack.c.bf16 %v1332_v3, %v1332_v3 }
 0x269   :  { %v1654_v22 = vrot.slane %v1546_v34, 3  ;;  %v1335_v8 = vmax.f32 %v989_v37, %v3587_v59  ;;  %v1411_v48 = vpack.c.bf16 %v1333_v32, %v1333_v32  ;;  %v1412_v6 = vpack.c.bf16 %v1334_v7, %v1334_v7 }
 0x26a   :  { %v4517_v51 = vunpack.c.l.b16 %v1421_v31  ;;  %v1656_v45 = vrot.slane %v4510_v41, 2  ;;  %v1538_v10 = vunpack.c.l.b16 %v1410_v2  ;;  %v1501_v63 = vunpack.c.l.b16 %v1373_v46  ;;  %3791 = vmatpush3.bf16.msra.mxu1 %v3883_v9 }
 0x26b   :  { %v4521_v35 = vsel %vm1561_vm15, %v1654_v22, %v1653_v14  ;;  %v1658_v19 = vrot.slane %v4512_v18, 1  ;;  %v1413_v55 = vpack.c.bf16 %v1335_v8, %v1335_v8  ;;  %v4524_v30 = vunpack.c.l.b16 %v1411_v48 }
 0x26c   :  { %v1640_v50 = vsel %vm1558_vm14, %v1639_v61, %v1638_v29  ;;  %v1641_v39 = vrot.slane %v1538_v10, 3  ;;  %v1579_v31 = vsel %vm1564_vm1, %v1578_v27, %v4377_v26  ;;  %v1365_v7 = vpack.c.bf16 %v4382_v40, %v4382_v40 }
 0x26d   :  { %v4533_v46 = vunpack.c.l.b16 %v1412_v6  ;;  %v4535_v14 = vunpack.c.l.b16 %v1413_v55  ;;  %v1643_v37 = vrot.slane %v4524_v30, 2  ;;  %v1581_v16 = vsel %vm1567_vm2, %v1580_v33, %v1579_v31 }
 0x26e   :  { %v4551_v26 = vsel %vm1561_vm15, %v1641_v39, %v1640_v50  ;;  %v1661_v27 = vpack.c.b16 %v1501_v63, %v1581_v16  ;;  %v1493_v33 = vunpack.c.l.b16 %v1365_v7  ;;  %v1565_v40 = vsel %vm1564_vm1, %v1563_v56, %v4397_v60 }
 0x26f   :  { %v1568_v29 = vsel %vm1567_vm2, %v1566_v5, %v1565_v40  ;;  %v1389_v25 = vpack.c.bf16 %v4418_v58, %v4418_v58  ;;  %v1605_v20 = vsel %vm1564_vm1, %v1604_v4, %v4425_v62  ;;  %v1381_v28 = vpack.c.bf16 %v4428_v49, %v4428_v49  ;;  %v3884_v58 = vld [vmem:[%s5203_s4 + $0x20] sm:$0xff]  }
 0x270   :  { %v1680_v43 = vsel %vm4543_vm7, 0, %v1661_v27  ;;  %v1660_v56 = vpack.c.b16 %v1493_v33, %v1568_v29  ;;  %v1607_v44 = vsel %vm1567_vm2, %v1606_v21, %v1605_v20  ;;  %v5228_v60 = vrot.slane %v4431_v11, 2  ;;  %3792 = vmatprep.subr.bf16.mxu1 %v3884_v58 }
 0x271   :  { %v4588_v1 = vsel %vm4555_vm8, %v1680_v43, 0  ;;  %v1517_v62 = vunpack.c.l.b16 %v1389_v25  ;;  %v1509_v4 = vunpack.c.l.b16 %v1381_v28  ;;  %v1645_v21 = vrot.slane %v4533_v46, 1  ;;  %3793 = vmatpush3.bf16.msra.mxu1 %v3884_v58 }
 0x272   :  { %v1592_v5 = vsel %vm1564_vm1, %v5228_v60, %v4441_v52  ;;  %v1779_v11 = vrot.slane %v4588_v1, 1  ;;  %v1679_v52 = vsel %vm4543_vm7, 0, %v1660_v56  ;;  %v1708_v23 = vshll.u32 %v4588_v1, 16 }
 0x273   :  { %v1594_v49 = vsel %vm1567_vm2, %v5229_v57, %v1592_v5  ;;  %v4600_v3 = vsel %vm4555_vm8, %v1679_v52, 0  ;;  %v1663_v34 = vpack.c.b16 %v1517_v62, %v1607_v44  ;;  %v1706_v2 = vshrl.u32 %v4588_v1, 16 }
 0x274   :  { %v1662_v59 = vpack.c.b16 %v1509_v4, %v1594_v49  ;;  %1788 = vrot.lane.b32.xlu1 %v1779_v11, %s3950_s22  ;;  %v1778_v32 = vrot.slane %v4600_v3, 1  ;;  %v1710_v36 = vrot.slane %v1708_v23, 1  ;;  %v1701_v22 = vshll.u32 %v4600_v3, 16 }
 0x275   :  { %v1699_v8 = vshrl.u32 %v4600_v3, 16  ;;  %v1682_v48 = vsel %vm4543_vm7, 0, %v1663_v34  ;;  %v1631_v10 = vsel %vm1564_vm1, %v5230_v42, %v4475_v12  ;;  %v1533_v46 = vunpack.c.l.b16 %v1405_v17  ;;  %v3885_v12 = vld [vmem:[%s5203_s4 + $0x28] sm:$0xff]  }
 0x276   :  { %v1681_v6 = vsel %vm4543_vm7, 0, %v1662_v59  ;;  %1786 = vrot.lane.b32.xlu0 %v1778_v32, %s3950_s22  ;;  %v1711_v63 = vor.u32 %v1710_v36, %v1706_v2  ;;  %v1703_v55 = vrot.slane %v1701_v22, 1  ;;  %v4620_v50 = vsel %vm4555_vm8, %v1682_v48, 0  ;;  %3794 = vmatprep.subr.bf16.mxu1 %v3885_v12 }
 0x277   :  { %v4624_v39 = vsel %vm4555_vm8, %v1681_v6, 0  ;;  %v1781_v31 = vrot.slane %v4620_v50, 1  ;;  %v1722_v54 = vshll.u32 %v4620_v50, 16  ;;  %v1720_v9 = vshrl.u32 %v4620_v50, 16  ;;  %3795 = vmatpush3.bf16.msra.mxu1 %v3885_v12 }
 0x278   :  { %v1780_v7 = vrot.slane %v4624_v39, 1  ;;  %1756 = vrot.lane.b32.xlu1 %v1711_v63, %s3951_s24  ;;  %v1704_v16 = vor.u32 %v1703_v55, %v1699_v8  ;;  %v1715_v27 = vshll.u32 %v4624_v39, 16  ;;  %v5231_v33 = vrot.slane %v4467_v47, 1 }
 0x279   :  { %v1724_v29 = vrot.slane %v1722_v54, 1  ;;  %v1397_v20 = vpack.c.bf16 %v4480_v38, %v4480_v38  ;;  %v5232_v28 = vrot.slane %v4482_v53, 2  ;;  %v5233_v44 = vrot.slane %v4485_v0, 1 }
 0x27a   :  { %v1633_v40 = vsel %vm1567_vm2, %v5231_v33, %v1631_v10  ;;  %1754 = vrot.lane.b32.xlu0 %v1704_v16, %s3951_s24  ;;  %v1717_v56 = vrot.slane %v1715_v27, 1  ;;  %v1657_v60 = vsel %vm1564_vm1, %v1656_v45, %v4521_v35  ;;  %v1644_v38 = vsel %vm1564_vm1, %v1643_v37, %v4551_v26 }
 0x27b   :  { %v1665_v25 = vpack.c.b16 %v1533_v46, %v1633_v40  ;;  %v1618_v43 = vsel %vm1564_vm1, %v5232_v28, %v4488_v15  ;;  %v1713_v53 = vshrl.u32 %v4624_v39, 16  ;;  %v1525_v5 = vunpack.c.l.b16 %v1397_v20 }
 0x27c   :  { %v1620_v47 = vsel %vm1567_vm2, %v5233_v44, %v1618_v43  ;;  %v1659_v0 = vsel %vm1567_vm2, %v1658_v19, %v1657_v60  ;;  %1792 = vrot.lane.b32.xlu1 %v1781_v31, %s3950_s22  ;;  %v1725_v41 = vor.u32 %v1724_v29, %v1720_v9  ;;  %v1646_v30 = vsel %vm1567_vm2, %v1645_v21, %v1644_v38 }
 0x27d   :  { %v1684_v15 = vsel %vm4543_vm7, 0, %v1665_v25  ;;  %v1667_v35 = vpack.c.b16 %v4517_v51, %v1659_v0  ;;  %v1664_v37 = vpack.c.b16 %v1525_v5, %v1620_v47  ;;  %v1718_v58 = vor.u32 %v1717_v56, %v1713_v53 }
 0x27e   :  { %v4665_v45 = vsel %vm4555_vm8, %v1684_v15, 0  ;;  %1790 = vrot.lane.b32.xlu0 %v1780_v7, %s3950_s22  ;;  %v1666_v19 = vpack.c.b16 %v4535_v14, %v1646_v30 }
 0x27f   :  { %v1736_v26 = vshll.u32 %v4665_v45, 16  ;;  %v1686_v18 = vsel %vm4543_vm7, 0, %v1667_v35  ;;  %v1783_v62 = vrot.slane %v4665_v45, 1  ;;  %v1683_v4 = vsel %vm4543_vm7, 0, %v1664_v37 }
 0x280   :  { %v4679_v51 = vsel %vm4555_vm8, %v1686_v18, 0  ;;  %1760 = vrot.lane.b32.xlu1 %v1725_v41, %s3951_s24  ;;  %v1694_v57 = vsel %vm4555_vm8, %v1683_v4, 0  ;;  %v1685_v14 = vsel %vm4543_vm7, 0, %v1666_v19  ;;  %v1734_v23 = vshrl.u32 %v4665_v45, 16  ;;  %v3886_v18 = vld [vmem:[%s5206_s7] sm:$0xff]   ;;  %v3888_v4 = vld [vmem:[%s5206_s7 + $0x10] sm:$0xff]  }
 0x281   :  { %v1738_v49 = vrot.slane %v1736_v26, 1  ;;  %v1750_v21 = vshll.u32 %v4679_v51, 16  ;;  %v1729_v11 = vshll.u32 %v1694_v57, 16  ;;  %v1782_v52 = vrot.slane %v1694_v57, 1 }
 0x282   :  { %1758 = vrot.lane.b32.xlu0 %v1718_v58, %s3951_s24  ;;  %v1696_v34 = vsel %vm4555_vm8, %v1685_v14, 0  ;;  %v1727_v2 = vshrl.u32 %v1694_v57, 16  ;;  %v1748_v8 = vshrl.u32 %v4679_v51, 16  ;;  %v1785_v10 = vrot.slane %v4679_v51, 1  ;;  %v3893_v14 = vld [vmem:[%s5206_s7 + $0x38] sm:$0xff]  }
 0x283   :  { %v1731_v59 = vrot.slane %v1729_v11, 1  ;;  %v1743_v17 = vshll.u32 %v1696_v34, 16  ;;  %v1739_v32 = vor.u32 %v1738_v49, %v1734_v23  ;;  %v1752_v36 = vrot.slane %v1750_v21, 1  ;;  %v3891_v49 = vld [vmem:[%s5206_s7 + $0x28] sm:$0xff]   ;;  %v3892_v21 = vld [vmem:[%s5206_s7 + $0x30] sm:$0xff]  }
 0x284   :  { %1796 = vrot.lane.b32.xlu1 %v1783_v62, %s3950_s22  ;;  %v1741_v42 = vshrl.u32 %v1696_v34, 16  ;;  %v1784_v63 = vrot.slane %v1696_v34, 1  ;;  %v3952_v19 = vmov 0   ;;  %v3887_v62 = vld [vmem:[%s5206_s7 + $0x8] sm:$0xff]   ;;  %v4763_v11 = vld [vmem:[%s5204_s5] ss:$0 sm:$0xff] }
 0x285   :  { %v1732_v22 = vor.u32 %v1731_v59, %v1727_v2  ;;  %v1745_v48 = vrot.slane %v1743_v17, 1  ;;  %v1753_v6 = vor.u32 %v1752_v36, %v1748_v8  ;;  %2815 = vmatprep.subr.bf16.mxu0 %v3952_v19 }
 0x286   :  { %1794 = vrot.lane.b32.xlu0 %v1782_v52, %s3950_s22  ;;  %2816 = vmatpush1.bf16.msra.mxu0 %v3886_v18  ;;  %v4768_v52 = vld [vmem:[%s5205_s6] ss:$0 sm:$0xff] }
 0x287   :  { %v1746_v13 = vor.u32 %v1745_v48, %v1741_v42  ;;  %2817 = vmatprep.subr.bf16.mxu0 %v3952_v19 }
 0x288   :  { %1764 = vrot.lane.b32.xlu1 %v1739_v32, %s3951_s24 }
 0x28a   :  { %1762 = vrot.lane.b32.xlu0 %v1732_v22, %s3951_s24  ;;  %2818 = vmatpush1.bf16.msra.mxu0 %v3887_v62 }
 0x28b   :  { %2819 = vmatprep.subr.bf16.mxu0 %v3952_v19 }
 0x28c   :  { %1768 = vrot.lane.b32.xlu1 %v1753_v6, %s3951_s24 }
 0x28e   :  { %1766 = vrot.lane.b32.xlu0 %v1746_v13, %s3951_s24  ;;  %2820 = vmatpush1.bf16.msra.mxu0 %v3888_v4 }
 0x28f   :  { %2821 = vmatprep.subr.bf16.mxu0 %v3952_v19 }
 0x290   :  { %1800 = vrot.lane.b32.xlu1 %v1785_v10, %s3950_s22 }
 0x292   :  { %1798 = vrot.lane.b32.xlu0 %v1784_v63, %s3950_s22 }
 0x2e6   :  { %v1789_v55 = vpop.permute.xlu1 %1788 }
 0x2e8   :  { %v1787_v31 = vpop.permute.xlu0 %1786 }
 0x2ea   :  { %v1757_v7 = vpop.permute.xlu1 %1756 }
 0x2eb   :  { %v1806_v54 = vsel %vm1802_vm0, %v4588_v1, %v1757_v7 }
 0x2ec   :  { %v1755_v46 = vpop.permute.xlu0 %1754  ;;  %v1823_v12 = vsel %vm1819_vm9, %v1806_v54, %v1789_v55 }
 0x2ed   :  { %v1804_v16 = vsel %vm1802_vm0, %v4600_v3, %v1755_v46 }
 0x2ee   :  { %v1793_v9 = vpop.permute.xlu1 %1792  ;;  %v1821_v27 = vsel %vm1819_vm9, %v1804_v16, %v1787_v31 }
 0x2ef   :  { %v3596_v33 = vcombine.low %v1821_v27, %v1823_v12 }
 0x2f0   :  { %v1791_v40 = vpop.permute.xlu0 %1790 }
 0x2f1   :  { %3796 = vmatprep.mubr.msk.bf16.mxu1 %vm1892_vm10, %v3596_v33 }
 0x2f2   :  { %v1761_v29 = vpop.permute.xlu1 %1760 }
 0x2f3   :  { %v1810_v25 = vsel %vm1802_vm0, %v4620_v50, %v1761_v29 }
 0x2f4   :  { %v1827_v1 = vsel %vm1819_vm9, %v1810_v25, %v1793_v9  ;;  %v1759_v20 = vpop.permute.xlu0 %1758 }
 0x2f5   :  { %v1808_v28 = vsel %vm1802_vm0, %v4624_v39, %v1759_v20 }
 0x2f6   :  { %v1825_v3 = vsel %vm1819_vm9, %v1808_v28, %v1791_v40  ;;  %v1797_v43 = vpop.permute.xlu1 %1796 }
 0x2f7   :  { %v3597_v56 = vcombine.low %v1825_v3, %v1827_v1 }
 0x2f8   :  { %v1795_v44 = vpop.permute.xlu0 %1794 }
 0x2f9   :  { %3797 = vmatmul.mubr.msk.bf16.vlgmr.msra.gmra.mrb[0].mxu1 %vm1892_vm10, %v3597_v56 }
 0x2fa   :  { %v1765_v47 = vpop.permute.xlu1 %1764 }
 0x2fb   :  { %v1814_v60 = vsel %vm1802_vm0, %v4665_v45, %v1765_v47 }
 0x2fc   :  { %v1831_v38 = vsel %vm1819_vm9, %v1814_v60, %v1797_v43  ;;  %v1763_v50 = vpop.permute.xlu0 %1762 }
 0x2fd   :  { %v1812_v53 = vsel %vm1802_vm0, %v1694_v57, %v1763_v50  ;;  %v3890_v57 = vld [vmem:[%s5206_s7 + $0x20] sm:$0xff]  }
 0x2fe   :  { %v1829_v15 = vsel %vm1819_vm9, %v1812_v53, %v1795_v44  ;;  %v1769_v5 = vpop.permute.xlu1 %1768 }
 0x2ff   :  { %v3598_v39 = vcombine.low %v1829_v15, %v1831_v38  ;;  %v1818_v41 = vsel %vm1802_vm0, %v4679_v51, %v1769_v5  ;;  %v3889_v51 = vld [vmem:[%s5206_s7 + $0x18] sm:$0xff]  }
 0x300   :  { %v1767_v0 = vpop.permute.xlu0 %1766  ;;  %2822 = vmatpush1.bf16.msra.mxu0 %v3889_v51 }
 0x301   :  { %3800 = vmatprep.mubr.msk.bf16.mxu1 %vm1892_vm10, %v3598_v39  ;;  %v1816_v45 = vsel %vm1802_vm0, %v1696_v34, %v1767_v0  ;;  %2823 = vmatprep.subr.bf16.mxu0 %v3952_v19 }
 0x302   :  { %v1801_v35 = vpop.permute.xlu1 %1800 }
 0x303   :  { %v1835_v30 = vsel %vm1819_vm9, %v1818_v41, %v1801_v35 }
 0x304   :  { %v1799_v37 = vpop.permute.xlu0 %1798  ;;  %2824 = vmatpush1.bf16.msra.mxu0 %v3890_v57 }
 0x305   :  { %v1833_v26 = vsel %vm1819_vm9, %v1816_v45, %v1799_v37  ;;  %2825 = vmatprep.subr.bf16.mxu0 %v3952_v19 }
 0x306   :  { %v3599_v58 = vcombine.low %v1833_v26, %v1835_v30 }
 0x308   :  { %3801 = vmatmul.mubr.msk.bf16.gmra.mrb[4].mxu1 %vm1892_vm10, %v3599_v58  ;;  %2826 = vmatpush1.bf16.msra.mxu0 %v3891_v49 }
 0x309   :  { %2827 = vmatprep.subr.bf16.mxu0 %v3952_v19 }
 0x30c   :  { %2828 = vmatpush1.bf16.msra.mxu0 %v3892_v21 }
 0x30d   :  { %2829 = vmatprep.subr.bf16.mxu0 %v3952_v19 }
 0x310   :  { %2830 = vmatpush1.bf16.msra.mxu0 %v3893_v14 }
 0x311   :  { %2831 = vmatprep.subr.bf16.mxu0 %v3952_v19 }
 0x3cc   :  { %v3798_v23 = vpop.f32.mrb[0].mxu1 }
 0x3cd   :  { %v1978_v34 = vmul.f32 %v3798_v23, %v4763_v11  ;;  %v1939_v59 = vpop.f32.mrb[1].mxu1 }
 0x3ce   :  { %v1976_v17 = vmul.f32 %v4763_v11, %v1939_v59  ;;  %v3799_v32 = vpop.f32.mrb[2].mxu1 }
 0x3cf   :  { %v1992_v2 = vadd.f32 %v4768_v52, %v1978_v34  ;;  %v1979_v36 = vmul.f32 %v3799_v32, %v4763_v11  ;;  %v1942_v22 = vpop.f32.mrb[3].mxu1 }
 0x3d0   :  { %v1990_v8 = vadd.f32 %v4768_v52, %v1976_v17  ;;  %v1977_v48 = vmul.f32 %v4763_v11, %v1942_v22 }
 0x3d1   :  { %v2000_v6 = vmax.f32 %v1992_v2, 0.0  ;;  %v1993_v42 = vadd.f32 %v4768_v52, %v1979_v36 }
 0x3d2   :  { %v1998_v13 = vmax.f32 %v1990_v8, 0.0  ;;  %v1991_v10 = vadd.f32 %v4768_v52, %v1977_v48 }
 0x3d3   :  { %v2048_v63 = vcombine.high %v2000_v6, %v2000_v6  ;;  %v2055_v55 = vrot.slane %v2000_v6, %v4308_v24  ;;  %v2001_v31 = vmax.f32 %v1993_v42, 0.0 }
 0x3d4   :  { %v2014_v7 = vcombine.high %v1998_v13, %v1998_v13  ;;  %v2021_v54 = vrot.slane %v1998_v13, %v4308_v24  ;;  %v4780_v46 = vmax.f32 %v1991_v10, 0.0 }
 0x3d5   :  { %v2062_v12 = vrot.slane %v2048_v63, %v4308_v24  ;;  %v2063_v16 = vcombine.high %v2055_v55, %v2055_v55  ;;  %v3620_v9 = vrot.slane %v2055_v55, 9  ;;  %v2065_v27 = vcombine.high %v2001_v31, %v2001_v31 }
 0x3d6   :  { %v2028_v33 = vrot.slane %v2014_v7, %v4308_v24  ;;  %v2029_v40 = vcombine.high %v2021_v54, %v2021_v54  ;;  %v3612_v29 = vrot.slane %v2021_v54, 9  ;;  %v2072_v25 = vrot.slane %v2001_v31, %v4308_v24 }
 0x3d7   :  { %v2064_v1 = vcombine.high %v2062_v12, %v2062_v12  ;;  %v3621_v20 = vrot.slane %v2063_v16, 9  ;;  %v3622_v28 = vrot.slane %v2062_v12, 9  ;;  %v2286_v3 = vmax.f32 %v2055_v55, %v3620_v9 }
 0x3d8   :  { %v2030_v43 = vcombine.high %v2028_v33, %v2028_v33  ;;  %v3613_v56 = vrot.slane %v2029_v40, 9  ;;  %v3614_v44 = vrot.slane %v2028_v33, 9  ;;  %v2278_v47 = vmax.f32 %v2021_v54, %v3612_v29 }
 0x3d9   :  { %v3623_v60 = vrot.slane %v2064_v1, 9  ;;  %v2287_v38 = vmax.f32 %v2063_v16, %v3621_v20  ;;  %v2288_v50 = vmax.f32 %v2062_v12, %v3622_v28  ;;  %v2344_v53 = vpack.c.bf16 %v2286_v3, %v2286_v3 }
 0x3da   :  { %v3615_v15 = vrot.slane %v2030_v43, 9  ;;  %v2279_v5 = vmax.f32 %v2029_v40, %v3613_v56  ;;  %v2280_v39 = vmax.f32 %v2028_v33, %v3614_v44  ;;  %v2336_v0 = vpack.c.bf16 %v2278_v47, %v2278_v47 }
 0x3db   :  { %v2289_v41 = vmax.f32 %v2064_v1, %v3623_v60  ;;  %v2345_v35 = vpack.c.bf16 %v2287_v38, %v2287_v38  ;;  %v2346_v30 = vpack.c.bf16 %v2288_v50, %v2288_v50  ;;  %v2408_v45 = vunpack.c.l.b16 %v2344_v53  ;;  %v3802_v37 = vpop.f32.mrb[4].mxu1 }
 0x3dc   :  { %v2281_v26 = vmax.f32 %v2030_v43, %v3615_v15  ;;  %v2337_v58 = vpack.c.bf16 %v2279_v5, %v2279_v5  ;;  %v2338_v18 = vpack.c.bf16 %v2280_v39, %v2280_v39  ;;  %v2400_v62 = vunpack.c.l.b16 %v2336_v0  ;;  %v1955_v4 = vpop.f32.mrb[5].mxu1 }
 0x3dd   :  { %v2347_v51 = vpack.c.bf16 %v2289_v41, %v2289_v41  ;;  %v2409_v57 = vunpack.c.l.b16 %v2345_v35  ;;  %v4785_v49 = vunpack.c.l.b16 %v2346_v30  ;;  %v2446_v21 = vrot.slane %v2408_v45, 7  ;;  %v4787_v14 = vpop.f32.mrb[6].mxu1 }
 0x3de   :  { %v2339_v23 = vpack.c.bf16 %v2281_v26, %v2281_v26  ;;  %v2401_v34 = vunpack.c.l.b16 %v2337_v58  ;;  %v4789_v59 = vunpack.c.l.b16 %v2338_v18  ;;  %v2432_v17 = vrot.slane %v2400_v62, 7  ;;  %v4791_v32 = vpop.f32.mrb[7].mxu1 }
 0x3df   :  { %v4793_v2 = vunpack.c.l.b16 %v2347_v51  ;;  %v2447_v36 = vrot.slane %v2409_v57, 6  ;;  %v2449_v22 = vrot.slane %v4785_v49, 5  ;;  %v2079_v8 = vrot.slane %v2065_v27, %v4308_v24 }
 0x3e0   :  { %v4797_v48 = vunpack.c.l.b16 %v2339_v23  ;;  %v2433_v6 = vrot.slane %v2401_v34, 6  ;;  %v2435_v42 = vrot.slane %v4789_v59, 5  ;;  %v2080_v13 = vcombine.high %v2072_v25, %v2072_v25 }
 0x3e1   :  { %v4801_v10 = vsel %vm1552_vm12, %v2447_v36, %v2446_v21  ;;  %v2451_v63 = vrot.slane %v4793_v2, 4  ;;  %v2081_v55 = vcombine.high %v2079_v8, %v2079_v8  ;;  %v3624_v31 = vrot.slane %v2072_v25, 9 }
 0x3e2   :  { %v4805_v7 = vsel %vm1552_vm12, %v2433_v6, %v2432_v17  ;;  %v2437_v54 = vrot.slane %v4797_v48, 4  ;;  %v3625_v12 = vrot.slane %v2080_v13, 9  ;;  %v3626_v16 = vrot.slane %v2079_v8, 9 }
 0x3e3   :  { %v3627_v9 = vrot.slane %v2081_v55, 9  ;;  %v2290_v27 = vmax.f32 %v2072_v25, %v3624_v31  ;;  %v2031_v33 = vcombine.high %v4780_v46, %v4780_v46  ;;  %v2038_v40 = vrot.slane %v4780_v46, %v4308_v24 }
 0x3e4   :  { %v2291_v29 = vmax.f32 %v2080_v13, %v3625_v12  ;;  %v2292_v1 = vmax.f32 %v2079_v8, %v3626_v16  ;;  %v1982_v20 = vmul.f32 %v3802_v37, %v4763_v11  ;;  %v1980_v28 = vmul.f32 %v4763_v11, %v1955_v4 }
 0x3e5   :  { %v2293_v3 = vmax.f32 %v2081_v55, %v3627_v9  ;;  %v2348_v43 = vpack.c.bf16 %v2290_v27, %v2290_v27  ;;  %v2045_v56 = vrot.slane %v2031_v33, %v4308_v24  ;;  %v2046_v44 = vcombine.high %v2038_v40, %v2038_v40 }
 0x3e6   :  { %v2349_v47 = vpack.c.bf16 %v2291_v29, %v2291_v29  ;;  %v2350_v60 = vpack.c.bf16 %v2292_v1, %v2292_v1  ;;  %v3616_v25 = vrot.slane %v2038_v40, 9  ;;  %v1996_v38 = vadd.f32 %v4768_v52, %v1982_v20 }
 0x3e7   :  { %v2351_v50 = vpack.c.bf16 %v2293_v3, %v2293_v3  ;;  %v2412_v53 = vunpack.c.l.b16 %v2348_v43  ;;  %v2047_v15 = vcombine.high %v2045_v56, %v2045_v56  ;;  %v3617_v46 = vrot.slane %v2046_v44, 9 }
 0x3e8   :  { %v2413_v5 = vunpack.c.l.b16 %v2349_v47  ;;  %v4816_v39 = vunpack.c.l.b16 %v2350_v60  ;;  %v3618_v0 = vrot.slane %v2045_v56, 9  ;;  %v2282_v41 = vmax.f32 %v2038_v40, %v3616_v25 }
 0x3e9   :  { %v4818_v35 = vunpack.c.l.b16 %v2351_v50  ;;  %v2453_v30 = vrot.slane %v2412_v53, 7  ;;  %v3619_v45 = vrot.slane %v2047_v15, 9  ;;  %v2283_v37 = vmax.f32 %v2046_v44, %v3617_v46 }
 0x3ea   :  { %v2454_v26 = vrot.slane %v2413_v5, 6  ;;  %v2456_v58 = vrot.slane %v4816_v39, 5  ;;  %v2284_v18 = vmax.f32 %v2045_v56, %v3618_v0  ;;  %v2340_v62 = vpack.c.bf16 %v2282_v41, %v2282_v41 }
 0x3eb   :  { %v2458_v4 = vrot.slane %v4818_v35, 4  ;;  %v2285_v51 = vmax.f32 %v2047_v15, %v3619_v45  ;;  %v2341_v57 = vpack.c.bf16 %v2283_v37, %v2283_v37  ;;  %v2004_v21 = vmax.f32 %v1996_v38, 0.0 }
 0x3ec   :  { %v4823_v23 = vsel %vm1552_vm12, %v2454_v26, %v2453_v30  ;;  %v2342_v34 = vpack.c.bf16 %v2284_v18, %v2284_v18  ;;  %v2404_v17 = vunpack.c.l.b16 %v2340_v62  ;;  %v1994_v36 = vadd.f32 %v4768_v52, %v1980_v28 }
 0x3ed   :  { %v2343_v8 = vpack.c.bf16 %v2285_v51, %v2285_v51  ;;  %v2405_v6 = vunpack.c.l.b16 %v2341_v57  ;;  %v2116_v13 = vcombine.high %v2004_v21, %v2004_v21  ;;  %v2123_v55 = vrot.slane %v2004_v21, %v4308_v24 }
 0x3ee   :  { %v4827_v31 = vunpack.c.l.b16 %v2342_v34  ;;  %v2439_v12 = vrot.slane %v2404_v17, 7  ;;  %v2002_v16 = vmax.f32 %v1994_v36, 0.0  ;;  %v1983_v9 = vmul.f32 %v4787_v14, %v4763_v11 }
 0x3ef   :  { %v4831_v27 = vunpack.c.l.b16 %v2343_v8  ;;  %v2440_v33 = vrot.slane %v2405_v6, 6  ;;  %v2130_v40 = vrot.slane %v2116_v13, %v4308_v24  ;;  %v2131_v29 = vcombine.high %v2123_v55, %v2123_v55 }
 0x3f0   :  { %v2442_v1 = vrot.slane %v4827_v31, 5  ;;  %v3636_v20 = vrot.slane %v2123_v55, 9  ;;  %v2082_v28 = vcombine.high %v2002_v16, %v2002_v16  ;;  %v2089_v3 = vrot.slane %v2002_v16, %v4308_v24 }
 0x3f1   :  { %v4837_v43 = vsel %vm1552_vm12, %v2440_v33, %v2439_v12  ;;  %v2444_v56 = vrot.slane %v4831_v27, 4  ;;  %v2132_v44 = vcombine.high %v2130_v40, %v2130_v40  ;;  %v3637_v47 = vrot.slane %v2131_v29, 9 }
 0x3f2   :  { %v3638_v14 = vrot.slane %v2130_v40, 9  ;;  %v2302_v60 = vmax.f32 %v2123_v55, %v3636_v20  ;;  %v2096_v25 = vrot.slane %v2082_v28, %v4308_v24  ;;  %v2097_v38 = vcombine.high %v2089_v3, %v2089_v3 }
 0x3f3   :  { %v3639_v50 = vrot.slane %v2132_v44, 9  ;;  %v2303_v53 = vmax.f32 %v2131_v29, %v3637_v47  ;;  %v3628_v15 = vrot.slane %v2089_v3, 9  ;;  %v1997_v46 = vadd.f32 %v4768_v52, %v1983_v9 }
 0x3f4   :  { %v2304_v5 = vmax.f32 %v2130_v40, %v3638_v14  ;;  %v2360_v0 = vpack.c.bf16 %v2302_v60, %v2302_v60  ;;  %v2098_v41 = vcombine.high %v2096_v25, %v2096_v25  ;;  %v3629_v30 = vrot.slane %v2097_v38, 9 }
 0x3f5   :  { %v2305_v45 = vmax.f32 %v2132_v44, %v3639_v50  ;;  %v2361_v37 = vpack.c.bf16 %v2303_v53, %v2303_v53  ;;  %v3630_v26 = vrot.slane %v2096_v25, 9  ;;  %v2294_v18 = vmax.f32 %v2089_v3, %v3628_v15 }
 0x3f6   :  { %v2362_v62 = vpack.c.bf16 %v2304_v5, %v2304_v5  ;;  %v2424_v51 = vunpack.c.l.b16 %v2360_v0  ;;  %v3631_v57 = vrot.slane %v2098_v41, 9  ;;  %v2295_v21 = vmax.f32 %v2097_v38, %v3629_v30 }
 0x3f7   :  { %v2363_v34 = vpack.c.bf16 %v2305_v45, %v2305_v45  ;;  %v2425_v17 = vunpack.c.l.b16 %v2361_v37  ;;  %v2296_v36 = vmax.f32 %v2096_v25, %v3630_v26  ;;  %v2352_v8 = vpack.c.bf16 %v2294_v18, %v2294_v18 }
 0x3f8   :  { %v4842_v6 = vunpack.c.l.b16 %v2362_v62  ;;  %v2474_v13 = vrot.slane %v2424_v51, 7  ;;  %v2297_v55 = vmax.f32 %v2098_v41, %v3631_v57  ;;  %v2353_v12 = vpack.c.bf16 %v2295_v21, %v2295_v21 }
 0x3f9   :  { %v4844_v16 = vunpack.c.l.b16 %v2363_v34  ;;  %v2475_v9 = vrot.slane %v2425_v17, 6  ;;  %v2354_v33 = vpack.c.bf16 %v2296_v36, %v2296_v36  ;;  %v2416_v40 = vunpack.c.l.b16 %v2352_v8 }
 0x3fa   :  { %v2477_v29 = vrot.slane %v4842_v6, 5  ;;  %v2355_v20 = vpack.c.bf16 %v2297_v55, %v2297_v55  ;;  %v2417_v28 = vunpack.c.l.b16 %v2353_v12  ;;  %v2005_v3 = vmax.f32 %v1997_v46, 0.0 }
 0x3fb   :  { %v4848_v44 = vsel %vm1552_vm12, %v2475_v9, %v2474_v13  ;;  %v2479_v47 = vrot.slane %v4844_v16, 4  ;;  %v4851_v14 = vunpack.c.l.b16 %v2354_v33  ;;  %v2460_v60 = vrot.slane %v2416_v40, 7 }
 0x3fc   :  { %v4853_v25 = vunpack.c.l.b16 %v2355_v20  ;;  %v2461_v38 = vrot.slane %v2417_v28, 6  ;;  %v2133_v50 = vcombine.high %v2005_v3, %v2005_v3  ;;  %v2140_v53 = vrot.slane %v2005_v3, %v4308_v24 }
 0x3fd   :  { %v2463_v15 = vrot.slane %v4851_v14, 5  ;;  %v1981_v5 = vmul.f32 %v4763_v11, %v4791_v32  ;;  %v2450_v46 = vsel %vm1555_vm13, %v2449_v22, %v4801_v10  ;;  %v2457_v0 = vsel %vm1555_vm13, %v2456_v58, %v4823_v23 }
 0x3fe   :  { %v4868_v41 = vsel %vm1552_vm12, %v2461_v38, %v2460_v60  ;;  %v2465_v30 = vrot.slane %v4853_v25, 4  ;;  %v2147_v45 = vrot.slane %v2133_v50, %v4308_v24  ;;  %v2148_v37 = vcombine.high %v2140_v53, %v2140_v53  ;;  %v3895_v25 = vld [vmem:[%s5206_s7 + $0x48] sm:$0xff]  }
 0x3ff   :  { %v3640_v26 = vrot.slane %v2140_v53, 9  ;;  %v1995_v11 = vadd.f32 %v4768_v52, %v1981_v5  ;;  %v2452_v49 = vsel %vm1558_vm14, %v2451_v63, %v2450_v46  ;;  %v2459_v32 = vsel %vm1558_vm14, %v2458_v4, %v2457_v0 }
 0x400   :  { %v2149_v10 = vcombine.high %v2147_v45, %v2147_v45  ;;  %v3641_v39 = vrot.slane %v2148_v37, 9  ;;  %v3642_v58 = vrot.slane %v2147_v45, 9  ;;  %v2490_v23 = vpack.c.b16 %v2452_v49, %v2452_v49 }
 0x401   :  { %v2306_v18 = vmax.f32 %v2140_v53, %v3640_v26  ;;  %v2003_v52 = vmax.f32 %v1995_v11, 0.0  ;;  %v2491_v62 = vpack.c.b16 %v2459_v32, %v2459_v32  ;;  %v2436_v2 = vsel %vm1555_vm13, %v2435_v42, %v4805_v7 }
 0x402   :  { %v3643_v63 = vrot.slane %v2149_v10, 9  ;;  %v2307_v35 = vmax.f32 %v2148_v37, %v3641_v39  ;;  %v2308_v4 = vmax.f32 %v2147_v45, %v3642_v58  ;;  %v2506_v51 = vsel %vm4543_vm7, 0, %v2490_v23 }
 0x403   :  { %v2364_v57 = vpack.c.bf16 %v2306_v18, %v2306_v18  ;;  %v2099_v21 = vcombine.high %v2003_v52, %v2003_v52  ;;  %v2106_v34 = vrot.slane %v2003_v52, %v4308_v24  ;;  %v4894_v17 = vsel %vm4881_vm3, %v2506_v51, 0 }
 0x404   :  { %v2309_v36 = vmax.f32 %v2149_v10, %v3643_v63  ;;  %v2365_v8 = vpack.c.bf16 %v2307_v35, %v2307_v35  ;;  %v2366_v13 = vpack.c.bf16 %v2308_v4, %v2308_v4  ;;  %v2538_v59 = vshrl.u32 %v4894_v17, 16 }
 0x405   :  { %v2428_v42 = vunpack.c.l.b16 %v2364_v57  ;;  %v2113_v7 = vrot.slane %v2099_v21, %v4308_v24  ;;  %v2114_v55 = vcombine.high %v2106_v34, %v2106_v34  ;;  %v3632_v12 = vrot.slane %v2106_v34, 9 }
 0x406   :  { %v2367_v9 = vpack.c.bf16 %v2309_v36, %v2309_v36  ;;  %v2429_v33 = vunpack.c.l.b16 %v2365_v8  ;;  %v4898_v40 = vunpack.c.l.b16 %v2366_v13  ;;  %v2540_v20 = vshll.u32 %v4894_v17, 16 }
 0x407   :  { %v2481_v28 = vrot.slane %v2428_v42, 7  ;;  %v2115_v3 = vcombine.high %v2113_v7, %v2113_v7  ;;  %v3633_v60 = vrot.slane %v2114_v55, 9  ;;  %v3634_v38 = vrot.slane %v2113_v7, 9 }
 0x408   :  { %v4901_v50 = vunpack.c.l.b16 %v2367_v9  ;;  %v2482_v53 = vrot.slane %v2429_v33, 6  ;;  %v2484_v5 = vrot.slane %v4898_v40, 5  ;;  %v2298_v46 = vmax.f32 %v2106_v34, %v3632_v12 }
 0x409   :  { %v3635_v0 = vrot.slane %v2115_v3, 9  ;;  %v2299_v45 = vmax.f32 %v2114_v55, %v3633_v60  ;;  %v2300_v37 = vmax.f32 %v2113_v7, %v3634_v38  ;;  %v2542_v26 = vrot.slane %v2540_v20, 1 }
 0x40a   :  { %v2483_v11 = vsel %vm1552_vm12, %v2482_v53, %v2481_v28  ;;  %v2486_v49 = vrot.slane %v4901_v50, 4  ;;  %v2356_v32 = vpack.c.bf16 %v2298_v46, %v2298_v46  ;;  %v2507_v10 = vsel %vm4543_vm7, 0, %v2491_v62 }
 0x40b   :  { %v2301_v39 = vmax.f32 %v2115_v3, %v3635_v0  ;;  %v2357_v58 = vpack.c.bf16 %v2299_v45, %v2299_v45  ;;  %v2358_v23 = vpack.c.bf16 %v2300_v37, %v2300_v37  ;;  %v2543_v18 = vor.u32 %v2542_v26, %v2538_v59  ;;  %v3896_v37 = vld [vmem:[%s5206_s7 + $0x50] sm:$0xff]  }
 0x40c   :  { %v2420_v52 = vunpack.c.l.b16 %v2356_v32  ;;  %v4910_v63 = vsel %vm4881_vm3, %v2507_v10, 0  ;;  %v2438_v35 = vsel %vm1558_vm14, %v2437_v54, %v2436_v2  ;;  %v2443_v4 = vsel %vm1555_vm13, %v2442_v1, %v4837_v43  ;;  %v3894_v54 = vld [vmem:[%s5206_s7 + $0x40] sm:$0xff]  }
 0x40d   :  { %v2359_v51 = vpack.c.bf16 %v2301_v39, %v2301_v39  ;;  %v2421_v62 = vunpack.c.l.b16 %v2357_v58  ;;  %v2422_v57 = vunpack.c.l.b16 %v2358_v23  ;;  %2583 = vrot.lane.b32.xlu0 %v2543_v18, %s3950_s22  ;;  %v2545_v21 = vshrl.u32 %v4910_v63, 16  ;;  %2832 = vmatpush1.bf16.msra.mxu0 %v3894_v54 }
 0x40e   :  { %v2467_v34 = vrot.slane %v2420_v52, 7  ;;  %v2547_v36 = vshll.u32 %v4910_v63, 16  ;;  %v2488_v8 = vpack.c.b16 %v2438_v35, %v2438_v35  ;;  %v2445_v48 = vsel %vm1558_vm14, %v2444_v56, %v2443_v4  ;;  %2833 = vmatprep.subr.bf16.mxu0 %v3952_v19  ;;  %v3897_v35 = vld [vmem:[%s5206_s7 + $0x58] sm:$0xff]  }
 0x40f   :  { %v2423_v31 = vunpack.c.l.b16 %v2359_v51  ;;  %v2468_v1 = vrot.slane %v2421_v62, 6  ;;  %v2470_v43 = vrot.slane %v2422_v57, 5  ;;  %v2489_v2 = vpack.c.b16 %v2445_v48, %v2445_v48 }
 0x410   :  { %v2549_v13 = vrot.slane %v2547_v36, 1  ;;  %v2504_v59 = vsel %vm4543_vm7, 0, %v2488_v8  ;;  %v2464_v42 = vsel %vm1555_vm13, %v2463_v15, %v4868_v41  ;;  %v2478_v27 = vsel %vm1555_vm13, %v2477_v29, %v4848_v44 }
 0x411   :  { %v2469_v56 = vsel %vm1552_vm12, %v2468_v1, %v2467_v34  ;;  %v2472_v7 = vrot.slane %v2423_v31, 4  ;;  %v4941_v55 = vsel %vm4881_vm3, %v2504_v59, 0  ;;  %v2505_v12 = vsel %vm4543_vm7, 0, %v2489_v2  ;;  %2834 = vmatpush1.bf16.msra.mxu0 %v3895_v25 }
 0x412   :  { %v2550_v14 = vor.u32 %v2549_v13, %v2545_v21  ;;  %v2524_v15 = vshrl.u32 %v4941_v55, 16  ;;  %v2526_v6 = vshll.u32 %v4941_v55, 16  ;;  %v4950_v29 = vsel %vm4881_vm3, %v2505_v12, 0  ;;  %2835 = vmatprep.subr.bf16.mxu0 %v3952_v19 }
 0x413   :  { %v2531_v44 = vshrl.u32 %v4950_v29, 16  ;;  %v2533_v41 = vshll.u32 %v4950_v29, 16  ;;  %v2466_v9 = vsel %vm1558_vm14, %v2465_v30, %v2464_v42  ;;  %v2471_v33 = vsel %vm1555_vm13, %v2470_v43, %v2469_v56 }
 0x414   :  { %2585 = vrot.lane.b32.xlu1 %v2550_v14, %s3950_s22  ;;  %v2528_v40 = vrot.slane %v2526_v6, 1  ;;  %v2492_v20 = vpack.c.b16 %v2466_v9, %v2466_v9  ;;  %v2473_v28 = vsel %vm1558_vm14, %v2472_v7, %v2471_v33  ;;  %v2480_v3 = vsel %vm1558_vm14, %v2479_v47, %v2478_v27 }
 0x415   :  { %v2535_v60 = vrot.slane %v2533_v41, 1  ;;  %v2493_v38 = vpack.c.b16 %v2473_v28, %v2473_v28  ;;  %v2494_v50 = vpack.c.b16 %v2480_v3, %v2480_v3  ;;  %v2485_v53 = vsel %vm1555_vm13, %v2484_v5, %v2483_v11  ;;  %2836 = vmatpush1.bf16.msra.mxu0 %v3896_v37 }
 0x416   :  { %v2529_v30 = vor.u32 %v2528_v40, %v2524_v15  ;;  %v2508_v46 = vsel %vm4543_vm7, 0, %v2492_v20  ;;  %v2487_v0 = vsel %vm1558_vm14, %v2486_v49, %v2485_v53  ;;  %2837 = vmatprep.subr.bf16.mxu0 %v3952_v19  ;;  %v2606_v31 = vrot.slane %v4910_v63, 1 }
 0x417   :  { %v2536_v45 = vor.u32 %v2535_v60, %v2531_v44  ;;  %v4972_v16 = vsel %vm4881_vm3, %v2508_v46, 0  ;;  %v2509_v47 = vsel %vm4543_vm7, 0, %v2493_v38  ;;  %v2510_v5 = vsel %vm4543_vm7, 0, %v2494_v50 }
 0x418   :  { %2579 = vrot.lane.b32.xlu0 %v2529_v30, %s3950_s22  ;;  %v2554_v26 = vshll.u32 %v4972_v16, 16  ;;  %v2520_v11 = vsel %vm4881_vm3, %v2509_v47, 0  ;;  %v4987_v49 = vsel %vm4881_vm3, %v2510_v5, 0  ;;  %v2552_v39 = vshrl.u32 %v4972_v16, 16 }
 0x419   :  { %2581 = vrot.lane.b32.xlu1 %v2536_v45, %s3950_s22  ;;  %v2561_v32 = vshll.u32 %v2520_v11, 16  ;;  %v2568_v10 = vshll.u32 %v4987_v49, 16  ;;  %v2495_v23 = vpack.c.b16 %v2487_v0, %v2487_v0  ;;  %v2559_v18 = vshrl.u32 %v2520_v11, 16  ;;  %2838 = vmatpush1.bf16.msra.mxu0 %v3897_v35 }
 0x41a   :  { %v2556_v58 = vrot.slane %v2554_v26, 1  ;;  %v2566_v34 = vshrl.u32 %v4987_v49, 16  ;;  %v2605_v43 = vrot.slane %v4894_v17, 1  ;;  %v2603_v42 = vrot.slane %v4941_v55, 1 }
 0x41b   :  { %v2563_v52 = vrot.slane %v2561_v32, 1  ;;  %v2570_v51 = vrot.slane %v2568_v10, 1  ;;  %v2511_v62 = vsel %vm4543_vm7, 0, %v2495_v23  ;;  %v2604_v12 = vrot.slane %v4950_v29, 1 }
 0x41c   :  { %v2557_v4 = vor.u32 %v2556_v58, %v2552_v39  ;;  %v2522_v21 = vsel %vm4881_vm3, %v2511_v62, 0  ;;  %v2608_v20 = vrot.slane %v2520_v11, 1  ;;  %v2607_v3 = vrot.slane %v4972_v16, 1  ;;  %v3899_v62 = vld [vmem:[%s5209_s10 + $0x48] sm:$0xff]  }
 0x41d   :  { %v2564_v57 = vor.u32 %v2563_v52, %v2559_v18  ;;  %v2575_v36 = vshll.u32 %v2522_v21, 16  ;;  %v2571_v8 = vor.u32 %v2570_v51, %v2566_v34  ;;  %v2573_v48 = vshrl.u32 %v2522_v21, 16  ;;  %v3902_v34 = vld [vmem:[%s5209_s10 + $0x60] sm:$0xff]  }
 0x41e   :  { %2587 = vrot.lane.b32.xlu0 %v2557_v4, %s3950_s22  ;;  %v2609_v25 = vrot.slane %v4987_v49, 1  ;;  %v3898_v4 = vld [vmem:[%s5209_s10 + $0x40] sm:$0xff]   ;;  %v3953_v51 = vmov 0.0  }
 0x41f   :  { %2589 = vrot.lane.b32.xlu1 %v2564_v57, %s3950_s22  ;;  %v2577_v54 = vrot.slane %v2575_v36, 1  ;;  %3804 = vmatprep.subr.bf16.mxu1 %v3953_v51  ;;  %v3900_v57 = vld [vmem:[%s5209_s10 + $0x50] sm:$0xff]   ;;  %v3903_v36 = vld [vmem:[%s5209_s10 + $0x68] sm:$0xff]  }
 0x420   :  { %3844 = vmatprep.subr.bf16.mxu0 %v3953_v51  ;;  %3805 = vmatpush3.bf16.msra.mxu1 %v3898_v4 }
 0x421   :  { %v2578_v61 = vor.u32 %v2577_v54, %v2573_v48  ;;  %3806 = vmatprep.subr.bf16.mxu1 %v3953_v51  ;;  %3820 = vmatprep.mubr.msk.bf16.mxu1 %vm3954_vm6, %v3953_v51  ;;  %v3905_v48 = vld [vmem:[%s5209_s10 + $0x78] sm:$0xff]   ;;  %v3914_v54 = vld [vmem:[%s5212_s13] sm:$0xff]  }
 0x422   :  { %2591 = vrot.lane.b32.xlu0 %v2571_v8, %s3950_s22  ;;  %v3904_v8 = vld [vmem:[%s5209_s10 + $0x70] sm:$0xff]  }
 0x423   :  { %2593 = vrot.lane.b32.xlu1 %v2578_v61, %s3950_s22  ;;  %v3915_v61 = vld [vmem:[%s5212_s13 + $0x8] sm:$0xff]  }
 0x424   :  { %3807 = vmatpush3.bf16.msra.mxu1 %v3899_v62 }
 0x425   :  { %3808 = vmatprep.subr.bf16.mxu1 %v3953_v51 }
 0x428   :  { %3809 = vmatpush3.bf16.msra.mxu1 %v3900_v57 }
 0x429   :  { %3810 = vmatprep.subr.bf16.mxu1 %v3953_v51 }
 0x47f   :  { %v2584_v19 = vpop.permute.xlu0 %2583 }
 0x480   :  { %v2616_v22 = vsel %vm1819_vm9, %v4894_v17, %v2584_v19  ;;  %v3658_v19 = vld [vmem:[%s5207_s8] ss:$0 sm:$0xff] }
 0x481   :  { %v2651_v59 = vcombine.low %v2616_v22, %v2605_v43  ;;  %v5092_v22 = vld [vmem:[%s5208_s9] ss:$0 sm:$0xff] }
 0x483   :  { %v2658_v6 = vrot.slane %v2651_v59, %v4308_v24 }
 0x486   :  { %v2586_v1 = vpop.permute.xlu1 %2585 }
 0x487   :  { %v2618_v2 = vsel %vm1819_vm9, %v4910_v63, %v2586_v1 }
 0x488   :  { %v2659_v13 = vcombine.low %v2618_v2, %v2606_v31 }
 0x48a   :  { %v2580_v27 = vpop.permute.xlu0 %2579  ;;  %v2666_v56 = vrot.slane %v2659_v13, %v4308_v24 }
 0x48b   :  { %v2612_v7 = vsel %vm1819_vm9, %v4941_v55, %v2580_v27  ;;  %v2582_v14 = vpop.permute.xlu1 %2581 }
 0x48c   :  { %v2635_v15 = vcombine.low %v2612_v7, %v2603_v42  ;;  %v2614_v17 = vsel %vm1819_vm9, %v4950_v29, %v2582_v14  ;;  %v2700_v44 = vcombine.low %v2658_v6, %v2666_v56 }
 0x48d   :  { %v2643_v63 = vcombine.low %v2614_v17, %v2604_v12 }
 0x48e   :  { %v2642_v41 = vrot.slane %v2635_v15, %v4308_v24  ;;  %v2714_v29 = vrot.slane %v2700_v44, %v4308_v24 }
 0x48f   :  { %v2650_v9 = vrot.slane %v2643_v63, %v4308_v24 }
 0x490   :  { %v2588_v33 = vpop.permute.xlu0 %2587 }
 0x491   :  { %v2699_v40 = vcombine.low %v2642_v41, %v2650_v9  ;;  %v2620_v55 = vsel %vm1819_vm9, %v4972_v16, %v2588_v33  ;;  %v2590_v28 = vpop.permute.xlu1 %2589  ;;  %v2610_v16 = vrot.slane %v2522_v21, 1 }
 0x492   :  { %v2622_v60 = vsel %vm1819_vm9, %v2520_v11, %v2590_v28  ;;  %v2667_v53 = vcombine.low %v2620_v55, %v2607_v3 }
 0x493   :  { %v2707_v38 = vrot.slane %v2699_v40, %v4308_v24  ;;  %v2675_v50 = vcombine.low %v2622_v60, %v2608_v20 }
 0x494   :  { %v2592_v30 = vpop.permute.xlu0 %2591  ;;  %v2674_v11 = vrot.slane %v2667_v53, %v4308_v24 }
 0x495   :  { %v2715_v46 = vcombine.low %v2707_v38, %v2714_v29  ;;  %v2716_v0 = vcombine.high %v2707_v38, %v2714_v29  ;;  %v2624_v45 = vsel %vm1819_vm9, %v4987_v49, %v2592_v30  ;;  %v2682_v47 = vrot.slane %v2675_v50, %v4308_v24  ;;  %v2594_v37 = vpop.permute.xlu1 %2593 }
 0x496   :  { %v2683_v5 = vcombine.low %v2624_v45, %v2609_v25  ;;  %v2626_v26 = vsel %vm1819_vm9, %v2522_v21, %v2594_v37  ;;  %v3901_v21 = vld [vmem:[%s5209_s10 + $0x58] sm:$0xff]  }
 0x497   :  { %3656 = vmatprep.mubr.msk.bf16.mxu0 %vm1819_vm9, %v2716_v0  ;;  %v2691_v32 = vcombine.low %v2626_v26, %v2610_v16  ;;  %v2717_v10 = vcombine.low %v2674_v11, %v2682_v47  ;;  %3811 = vmatpush3.bf16.msra.mxu1 %v3901_v21 }
 0x498   :  { %2848 = vmatmul.mubr.bf16.vlgmr.msra.gmra.mrb[16].mxu0 %v2715_v46  ;;  %v2690_v39 = vrot.slane %v2683_v5, %v4308_v24  ;;  %3812 = vmatprep.subr.bf16.mxu1 %v3953_v51 }
 0x499   :  { %v2698_v58 = vrot.slane %v2691_v32, %v4308_v24  ;;  %v2725_v49 = vrot.slane %v2717_v10, %v4308_v24  ;;  %3845 = vmatpush3.bf16.msra.mxu0 %v3914_v54 }
 0x49a   :  { %3846 = vmatprep.subr.bf16.mxu0 %v3953_v51 }
 0x49b   :  { %v2718_v23 = vcombine.low %v2690_v39, %v2698_v58  ;;  %3813 = vmatpush3.bf16.msra.mxu1 %v3902_v34 }
 0x49c   :  { %3814 = vmatprep.subr.bf16.mxu1 %v3953_v51 }
 0x49d   :  { %v2732_v18 = vrot.slane %v2718_v23, %v4308_v24  ;;  %3847 = vmatpush3.bf16.msra.mxu0 %v3915_v61 }
 0x49e   :  { %3848 = vmatprep.subr.bf16.mxu0 %v3953_v51 }
 0x49f   :  { %v2734_v52 = vcombine.high %v2725_v49, %v2732_v18  ;;  %v2733_v35 = vcombine.low %v2725_v49, %v2732_v18  ;;  %3815 = vmatpush3.bf16.msra.mxu1 %v3903_v36 }
 0x4a0   :  { %3816 = vmatprep.subr.bf16.mxu1 %v3953_v51 }
 0x4a1   :  { %3657 = vmatprep.mubr.msk.bf16.mxu0 %vm1819_vm9, %v2734_v52 }
 0x4a2   :  { %2856 = vmatmul.mubr.bf16.gmra.mrb[20].mxu0 %v2733_v35 }
 0x4a3   :  { %3852 = vmatprep.mubr.msk.bf16.mxu0 %vm3954_vm6, %v3953_v51  ;;  %3817 = vmatpush3.bf16.msra.mxu1 %v3904_v8 }
 0x4a4   :  { %3818 = vmatprep.subr.bf16.mxu1 %v3953_v51 }
 0x4a7   :  { %3819 = vmatpush3.bf16.msra.mxu1 %v3905_v48 }
 0x4a8   :  { %3824 = vmatprep.subr.bf16.mxu1 %v3953_v51 }
 0x56b   :  { %v2849_v31 = vpop.f32.mrb[16].mxu0 }
 0x56c   :  { %v2870_v1 = vmul.f32 %v3658_v19, %v2849_v31  ;;  %v2851_v43 = vpop.f32.mrb[17].mxu0 }
 0x56d   :  { %v2852_v2 = vpop.f32.mrb[18].mxu0 }
 0x56e   :  { %v2880_v13 = vadd.f32 %v5092_v22, %v2870_v1  ;;  %v2871_v59 = vmul.f32 %v3658_v19, %v2852_v2  ;;  %v2854_v42 = vpop.f32.mrb[19].mxu0 }
 0x570   :  { %v2884_v27 = vmax.f32 %v2880_v13, 0.0  ;;  %v2881_v56 = vadd.f32 %v5092_v22, %v2871_v59 }
 0x572   :  { %v2892_v7 = vcombine.high %v2884_v27, %v2884_v27  ;;  %v2899_v12 = vrot.slane %v2884_v27, %v4308_v24  ;;  %v2885_v14 = vmax.f32 %v2881_v56, 0.0 }
 0x574   :  { %v2906_v15 = vrot.slane %v2892_v7, %v4308_v24  ;;  %v2907_v17 = vcombine.high %v2899_v12, %v2899_v12  ;;  %v3660_v6 = vrot.slane %v2899_v12, 9  ;;  %v2909_v63 = vcombine.high %v2885_v14, %v2885_v14 }
 0x575   :  { %v2916_v44 = vrot.slane %v2885_v14, %v4308_v24  ;;  %v2857_v55 = vpop.f32.mrb[20].mxu0 }
 0x576   :  { %v2908_v41 = vcombine.high %v2906_v15, %v2906_v15  ;;  %v3661_v9 = vrot.slane %v2907_v17, 9  ;;  %v3662_v33 = vrot.slane %v2906_v15, 9  ;;  %v3024_v40 = vmax.f32 %v2899_v12, %v3660_v6  ;;  %v2859_v29 = vpop.f32.mrb[21].mxu0 }
 0x577   :  { %v2923_v20 = vrot.slane %v2909_v63, %v4308_v24  ;;  %v2924_v28 = vcombine.high %v2916_v44, %v2916_v44  ;;  %v3664_v3 = vrot.slane %v2916_v44, 9  ;;  %v2872_v60 = vmul.f32 %v3658_v19, %v2857_v55  ;;  %v2860_v30 = vpop.f32.mrb[22].mxu0 }
 0x578   :  { %v3663_v38 = vrot.slane %v2908_v41, 9  ;;  %v3025_v50 = vmax.f32 %v2907_v17, %v3661_v9  ;;  %v3026_v53 = vmax.f32 %v2906_v15, %v3662_v33  ;;  %v3040_v25 = vpack.c.bf16 %v3024_v40, %v3024_v40  ;;  %v2862_v5 = vpop.f32.mrb[23].mxu0 }
 0x579   :  { %v2925_v46 = vcombine.high %v2923_v20, %v2923_v20  ;;  %v3665_v0 = vrot.slane %v2924_v28, 9  ;;  %v3666_v45 = vrot.slane %v2923_v20, 9  ;;  %v3028_v47 = vmax.f32 %v2916_v44, %v3664_v3 }
 0x57a   :  { %v3027_v16 = vmax.f32 %v2908_v41, %v3663_v38  ;;  %v3041_v37 = vpack.c.bf16 %v3025_v50, %v3025_v50  ;;  %v3042_v26 = vpack.c.bf16 %v3026_v53, %v3026_v53  ;;  %v3218_v11 = vunpack.c.l.b16 %v3040_v25 }
 0x57b   :  { %v3667_v32 = vrot.slane %v2925_v46, 9  ;;  %v3029_v10 = vmax.f32 %v2924_v28, %v3665_v0  ;;  %v3030_v39 = vmax.f32 %v2923_v20, %v3666_v45  ;;  %v3044_v58 = vpack.c.bf16 %v3028_v47, %v3028_v47 }
 0x57c   :  { %v3043_v23 = vpack.c.bf16 %v3027_v16, %v3027_v16  ;;  %v3097_v49 = vunpack.c.l.b16 %v3041_v37  ;;  %v3219_v18 = vunpack.c.l.b16 %v3042_v26  ;;  %v2882_v52 = vadd.f32 %v5092_v22, %v2872_v60 }
 0x57d   :  { %v3031_v35 = vmax.f32 %v2925_v46, %v3667_v32  ;;  %v3045_v4 = vpack.c.bf16 %v3029_v10, %v3029_v10  ;;  %v3046_v62 = vpack.c.bf16 %v3030_v39, %v3030_v39  ;;  %v3220_v57 = vunpack.c.l.b16 %v3044_v58 }
 0x57e   :  { %v3098_v21 = vunpack.c.l.b16 %v3043_v23  ;;  %v3226_v34 = vrot.slane %v3219_v18, 7  ;;  %v2886_v36 = vmax.f32 %v2882_v52, 0.0  ;;  %v2873_v8 = vmul.f32 %v3658_v19, %v2860_v30 }
 0x57f   :  { %v3047_v48 = vpack.c.bf16 %v3031_v35, %v3031_v35  ;;  %v3099_v54 = vunpack.c.l.b16 %v3045_v4  ;;  %v3221_v61 = vunpack.c.l.b16 %v3046_v62  ;;  %v3228_v31 = vrot.slane %v3220_v57, 6 }
 0x580   :  { %v3105_v1 = vrot.slane %v3098_v21, 7  ;;  %v3227_v43 = vsel %vm3106_vm4, %v3226_v34, %v3218_v11  ;;  %v2926_v2 = vcombine.high %v2886_v36, %v2886_v36  ;;  %v2933_v13 = vrot.slane %v2886_v36, %v4308_v24 }
 0x581   :  { %v3100_v59 = vunpack.c.l.b16 %v3047_v48  ;;  %v3108_v42 = vrot.slane %v3099_v54, 6  ;;  %v3229_v27 = vsel %vm1552_vm12, %v3228_v31, %v3227_v43  ;;  %v3230_v56 = vrot.slane %v3221_v61, 5 }
 0x582   :  { %v3107_v7 = vsel %vm3106_vm4, %v3105_v1, %v3097_v49  ;;  %v2940_v12 = vrot.slane %v2926_v2, %v4308_v24  ;;  %v2941_v19 = vcombine.high %v2933_v13, %v2933_v13  ;;  %v3668_v14 = vrot.slane %v2933_v13, 9 }
 0x583   :  { %v3109_v15 = vsel %vm1552_vm12, %v3108_v42, %v3107_v7  ;;  %v3110_v17 = vrot.slane %v3100_v59, 5  ;;  %v2883_v6 = vadd.f32 %v5092_v22, %v2873_v8  ;;  %v3231_v63 = vsel %vm1555_vm13, %v3230_v56, %v3229_v27  ;;  %v3906_v7 = vld [vmem:[%s5209_s10] sm:$0xff]  }
 0x584   :  { %v2942_v44 = vcombine.high %v2940_v12, %v2940_v12  ;;  %v3669_v41 = vrot.slane %v2941_v19, 9  ;;  %v3670_v9 = vrot.slane %v2940_v12, 9  ;;  %v3032_v33 = vmax.f32 %v2933_v13, %v3668_v14  ;;  %v3908_v14 = vld [vmem:[%s5209_s10 + $0x10] sm:$0xff]  }
 0x585   :  { %v3111_v40 = vsel %vm1555_vm13, %v3110_v17, %v3109_v15  ;;  %v2887_v55 = vmax.f32 %v2883_v6, 0.0  ;;  %v3909_v15 = vld [vmem:[%s5209_s10 + $0x18] sm:$0xff]   ;;  %v3910_v17 = vld [vmem:[%s5209_s10 + $0x20] sm:$0xff]   ;;  %v3911_v6 = vld [vmem:[%s5209_s10 + $0x28] sm:$0xff]  }
 0x586   :  { %v3671_v20 = vrot.slane %v2942_v44, 9  ;;  %v3033_v28 = vmax.f32 %v2941_v19, %v3669_v41  ;;  %v3034_v3 = vmax.f32 %v2940_v12, %v3670_v9  ;;  %v3048_v60 = vpack.c.bf16 %v3032_v33, %v3032_v33  ;;  %v3907_v19 = vld [vmem:[%s5209_s10 + $0x8] sm:$0xff]   ;;  %v3916_v9 = vld [vmem:[%s5212_s13 + $0x10] sm:$0xff]   ;;  %v3917_v33 = vld [vmem:[%s5212_s13 + $0x18] sm:$0xff]  }
 0x587   :  { %v2943_v29 = vcombine.high %v2887_v55, %v2887_v55  ;;  %v2950_v38 = vrot.slane %v2887_v55, %v4308_v24  ;;  %3849 = vmatpush3.bf16.msra.mxu0 %v3916_v9 }
 0x588   :  { %v3035_v50 = vmax.f32 %v2942_v44, %v3671_v20  ;;  %v3049_v53 = vpack.c.bf16 %v3033_v28, %v3033_v28  ;;  %v3050_v25 = vpack.c.bf16 %v3034_v3, %v3034_v3  ;;  %v3222_v22 = vunpack.c.l.b16 %v3048_v60  ;;  %v3913_v44 = vld [vmem:[%s5209_s10 + $0x38] sm:$0xff]   ;;  %3850 = vmatprep.subr.bf16.mxu0 %v3953_v51  ;;  %v3709_v20 = vld [vmem:[%s5211_s12] ss:$0 sm:$0xff] }
 0x589   :  { %v2957_v30 = vrot.slane %v2943_v29, %v4308_v24  ;;  %v2958_v46 = vcombine.high %v2950_v38, %v2950_v38  ;;  %v3672_v0 = vrot.slane %v2950_v38, 9 }
 0x58a   :  { %v3051_v45 = vpack.c.bf16 %v3035_v50, %v3035_v50  ;;  %v3101_v47 = vunpack.c.l.b16 %v3049_v53  ;;  %v3223_v5 = vunpack.c.l.b16 %v3050_v25  ;;  %v3232_v16 = vrot.slane %v3222_v22, 4  ;;  %v3918_v25 = vld [vmem:[%s5215_s16] sm:$0xff]   ;;  %v3919_v22 = vld [vmem:[%s5215_s16 + $0x8] sm:$0xff]  }
 0x58b   :  { %v2959_v37 = vcombine.high %v2957_v30, %v2957_v30  ;;  %v3673_v26 = vrot.slane %v2958_v46, 9  ;;  %v3674_v11 = vrot.slane %v2957_v30, 9  ;;  %v3036_v32 = vmax.f32 %v2950_v38, %v3672_v0  ;;  %3851 = vmatpush3.bf16.msra.mxu0 %v3917_v33  ;;  %v3716_v0 = vld [vmem:[%s5214_s15] ss:$0 sm:$0xff] }
 0x58c   :  { %v3102_v10 = vunpack.c.l.b16 %v3051_v45  ;;  %v3112_v39 = vrot.slane %v3101_v47, 4  ;;  %v3234_v58 = vrot.slane %v3223_v5, 3  ;;  %v3233_v23 = vsel %vm1558_vm14, %v3232_v16, %v3231_v63  ;;  %v3912_v63 = vld [vmem:[%s5209_s10 + $0x30] sm:$0xff]   ;;  %3856 = vmatprep.subr.bf16.mxu0 %v3953_v51 }
 0x58d   :  { %v3675_v49 = vrot.slane %v2959_v37, 9  ;;  %v3037_v18 = vmax.f32 %v2958_v46, %v3673_v26  ;;  %v3038_v52 = vmax.f32 %v2957_v30, %v3674_v11  ;;  %v3052_v35 = vpack.c.bf16 %v3036_v32, %v3036_v32  ;;  %v3715_v30 = vld [vmem:[%s5213_s14] ss:$0 sm:$0xff]  ;;  %s3514_s14 = sshll.u32 %s3955_s25, 4  ;;  %s3515_s14 = int_to_ptr.vmem [resolvable:$true] %s3514_s14 }
 0x58e   :  { %v3113_v24 = vsel %vm1558_vm14, %v3112_v39, %v3111_v40  ;;  %v3114_v4 = vrot.slane %v3102_v10, 3  ;;  %v3235_v62 = vsel %vm1561_vm15, %v3234_v58, %v3233_v23  ;;  %v3708_v40 = vld [vmem:[%s5210_s11] ss:$0 sm:$0xff]  ;;  %s3920_s15 = scalar_lea.vmem %s3515_s14, 128  ;;  %p3925_p1 = scmp.lt.s32.totalorder %s3515_s14, %s3515_s14 }
 0x58f   :  { %v3039_v57 = vmax.f32 %v2959_v37, %v3675_v49  ;;  %v3053_v21 = vpack.c.bf16 %v3037_v18, %v3037_v18  ;;  %v3054_v34 = vpack.c.bf16 %v3038_v52, %v3038_v52  ;;  %v3224_v36 = vunpack.c.l.b16 %v3052_v35  ;;  %p3921_p0 = scmp.ne.s32.totalorder %s3515_s14, %s3920_s15  ;;  %p3926_p2 = scmp.lt.s32.totalorder %s3920_s15, %s3920_s15 }
 0x590   :  { %v3115_v8 = vsel %vm1561_vm15, %v3114_v4, %v3113_v24 }
 0x591   :  { %v3055_v48 = vpack.c.bf16 %v3039_v57, %v3039_v57  ;;  %v3103_v54 = vunpack.c.l.b16 %v3053_v21  ;;  %v3225_v61 = vunpack.c.l.b16 %v3054_v34  ;;  %v3236_v31 = vrot.slane %v3224_v36, 2  ;;  %p3927_p3 = por %p3926_p2, %p3925_p1 }
 0x593   :  { %v3104_v1 = vunpack.c.l.b16 %v3055_v48  ;;  %v3116_v43 = vrot.slane %v3103_v54, 2  ;;  %v3237_v2 = vsel %vm1564_vm1, %v3236_v31, %v3235_v62  ;;  %v3238_v13 = vrot.slane %v3225_v61, 1  ;;  %p3928_p4 = pnand %p3927_p3, %p3921_p0 }
 0x595   :  { %v3118_v59 = vrot.slane %v3104_v1, 1  ;;  %v3117_v42 = vsel %vm1564_vm1, %v3116_v43, %v3115_v8  ;;  %v3239_v27 = vsel %vm1567_vm2, %v3238_v13, %v3237_v2 }
 0x596   :  { %v3240_v41 = vpack.c.b16 %v3239_v27, %v3239_v27 }
 0x597   :  { %v3119_v56 = vsel %vm1567_vm2, %v3118_v59, %v3117_v42 }
 0x598   :  { %v3120_v12 = vpack.c.b16 %v3119_v56, %v3119_v56 }
 0x59a   :  { %3821 = vmatmul.mubr.bf16.vlgmr.msra.gmra.mrb[8].mxu1 %v3120_v12 }
 0x59b   :  { %3825 = vmatpush3.bf16.msra.mxu1 %v3906_v7  ;;  %3840 = vmatprep.mubr.msk.bf16.mxu1 %vm3954_vm6, %v3953_v51 }
 0x59c   :  { %3826 = vmatprep.subr.bf16.mxu1 %v3953_v51 }
 0x59f   :  { %3827 = vmatpush3.bf16.msra.mxu1 %v3907_v19 }
 0x5a0   :  { %3828 = vmatprep.subr.bf16.mxu1 %v3953_v51 }
 0x5a3   :  { %3829 = vmatpush3.bf16.msra.mxu1 %v3908_v14 }
 0x5a4   :  { %3830 = vmatprep.subr.bf16.mxu1 %v3953_v51 }
 0x5a7   :  { %3831 = vmatpush3.bf16.msra.mxu1 %v3909_v15 }
 0x5a8   :  { %3832 = vmatprep.subr.bf16.mxu1 %v3953_v51 }
 0x5ab   :  { %3833 = vmatpush3.bf16.msra.mxu1 %v3910_v17 }
 0x5ac   :  { %3834 = vmatprep.subr.bf16.mxu1 %v3953_v51 }
 0x5af   :  { %3835 = vmatpush3.bf16.msra.mxu1 %v3911_v6 }
 0x5b0   :  { %3836 = vmatprep.subr.bf16.mxu1 %v3953_v51 }
 0x5b3   :  { %3837 = vmatpush3.bf16.msra.mxu1 %v3912_v63 }
 0x5b4   :  { %3838 = vmatprep.subr.bf16.mxu1 %v3953_v51 }
 0x5b7   :  { %3839 = vmatpush3.bf16.msra.mxu1 %v3913_v44 }
 0x5ba   :  { %3841 = vmatmul.mubr.bf16.vlgmr.msra.gmra.mrb[8].mxu1 %v3240_v41 }
 0x68d   :  { %v3324_v55 = vpop.f32.mrb[8].mxu1 }
 0x68e   :  { %v3337_v28 = vmul.f32 %v3708_v40, %v3324_v55  ;;  %v3842_v3 = vpop.f32.mrb[9].mxu1 }
 0x68f   :  { %v3327_v60 = vpop.f32.mrb[10].mxu1 }
 0x690   :  { %v3345_v29 = vadd.f32 %v3709_v20, %v3337_v28  ;;  %v3843_v38 = vpop.f32.mrb[11].mxu1 }
 0x692   :  { %v3346_v50 = vmax.f32 %v3345_v29, 0.0 }
 0x694   :  { %v3347_v53 = vpack.c.bf16 %v3346_v50, %v3346_v50 }
 0x696   :  { %3853 = vmatmul.mubr.msk.bf16.vlgmr.msra.gmra.mrb[24].mxu0 %vm1819_vm9, %v3347_v53 }
 0x697   :  { %3860 = vmatprep.mubr.msk.bf16.mxu0 %vm3954_vm6, %v3953_v51  ;;  %3857 = vmatpush3.bf16.msra.mxu0 %v3918_v25 }
 0x698   :  { %3858 = vmatprep.subr.bf16.mxu0 %v3953_v51  ;;  %v3717_v51 = vld [vmem:[%s5216_s17] ss:$0 sm:$0xff] }
 0x69b   :  { %3859 = vmatpush3.bf16.msra.mxu0 %v3919_v22 }
 0x769   :  { %v3417_v46 = vpop.f32.mrb[24].mxu0 }
 0x76a   :  { %v3430_v45 = vmul.f32 %v3715_v30, %v3417_v46  ;;  %v3854_v47 = vpop.f32.mrb[25].mxu0 }
 0x76b   :  { %v3420_v5 = vpop.f32.mrb[26].mxu0 }
 0x76c   :  { %v3438_v16 = vadd.f32 %v3716_v0, %v3430_v45  ;;  %v3855_v37 = vpop.f32.mrb[27].mxu0 }
 0x76e   :  { %v3439_v26 = vmax.f32 %v3438_v16, 0.0 }
 0x770   :  { %v3440_v11 = vpack.c.bf16 %v3439_v26, %v3439_v26 }
 0x772   :  { %3861 = vmatmul.mubr.msk.bf16.vlgmr.msra.gmra.mrb[28].mxu0 %vm1802_vm0, %v3440_v11 }
 0x845   :  { %v3501_v32 = vpop.f32.mrb[28].mxu0 }
 0x846   :  { %v3502_v10 = vadd.f32 %v3717_v51, %v3501_v32  ;;  %v3862_v39 = vpop.f32.mrb[29].mxu0 }
 0x847   :  { %v3504_v58 = vpop.f32.mrb[30].mxu0 }
 0x848   :  { %3507 = vst [vmem:[#allocation2] sm:$0xff] %v3502_v10  ;;  %v3863_v23 = vpop.f32.mrb[31].mxu0 }
 0x849   :  { %3931 = shalt.err (!%p3928_p4)
}
 0x84a   :  { %s3932_s17 = scalar_lea.hbm %s5217_s18, 128 }
 0x84b   :  { %p3933_p5 = scmp.ne.s32.totalorder %s5217_s18, %s3932_s17  ;;  %p3936_p6 = scmp.lt.u32.totalorder %s3932_s17, %s5217_s18 }
 0x84d   :  { %p3938_p7 = pnand %p3936_p6, %p3933_p5 }
 0x84f   :  { %3941 = shalt.err (!%p3938_p7)
}
 0x850   :  { %3517 = dma.vmem_to_hbm [thread:$0]  %s3515_s14, 128, %s5217_s18, [#allocation3]  }
 0x851   :  { %3942 = dma.done.wait [#allocation3], 128  }
 0x852   :  { %3943 = vsyncadd [#allocation3], 4294967168 }
 0x853   :  { %3521 = vsyncpa [#allocation3], 1 }

</bundles_post_ra>
